<compile_context>
chip_gen: v5e
topology: v5e:2x2
jax: 0.10.0
libtpu: 0.0.40
codegen_flags: <defaults>
</compile_context>

<pallas_src>
import functools

import numpy as np
import jax
import jax.numpy as jnp
from jax.experimental import pallas as pl
from jax.experimental.pallas import tpu as pltpu


VMEM_LIMIT_BYTES = 48 * 1024 * 1024


def _round_up(x, m):
    return -(-x // m) * m


def _tile_padded_bytes(shape, dtype):
    """VMEM bytes of a buffer after TPU tile padding (minor->128, 2nd-minor->8/16 by dtype)."""
    itemsize = np.dtype(dtype).itemsize
    if len(shape) == 1:
        return _round_up(shape[0] * itemsize, 4 * 128)
    sub = 8 * (4 // itemsize)                      # 8 for f32, 16 for bf16
    minor = _round_up(shape[-1], 128)
    second = _round_up(shape[-2], sub)
    lead = int(np.prod(shape[:-2], dtype=np.int64)) if len(shape) > 2 else 1
    return lead * second * minor * itemsize


# ----------------------------------------------------------------------------
# Fused kernel: conv3x3+bias+ReLU -> conv3x3+bias+ReLU -> maxpool2x2 (ceil_mode)
# ----------------------------------------------------------------------------
def _unet_dec_kernel(lhs_ref, w1_ref, b1_ref, w2_ref, b2_ref, out_ref,
                     h1w_ref, v_ref, *, H, W, P, Cout):
    """One batch image per grid step.

    lhs_ref : (L1, 15*Cin) bf16  host-side 3x5 im2col of the input; flat row p = h*P + w
                                 (pitch P = round_up(W, 8)).
    w1_ref  : (15*Cin, 3*Cout)   bf16  "wide" conv1 weights: output block dx is conv1
                                 evaluated at column w+dx (the dx shift is in the weights).
    b1_ref  : (1, 3*Cout) f32    bias tiled 3x.
    w2_ref  : (3, 3*Cout, Cout)  bf16  conv2 weights, dx folded into the contraction dim.
    b2_ref  : (1, Cout) f32
    out_ref : (Hp, Wp*Cout) f32  lane-dense pooled output.
    h1w_ref : (L1, 3*Cout) bf16  VMEM scratch: wide conv1 activation.
    v_ref   : (Hp, P, Cout) f32  VMEM scratch: vertically-pooled conv2 rows.

    Correctness invariants (do not change without re-deriving):
      * valid conv2 outputs (w2 < W-4) only read wide-conv1 entries with w2+dx <= W-3,
        which are exact conv1 values; everything else is garbage-but-finite and is never
        consumed by the pooling of valid positions.
      * ReLU output >= 0, so a zeroed partner column is a neutral element for the
        ceil-mode tail window of the horizontal max.
    """
    H1, H2, W2 = H - 2, H - 4, W - 4
    L2 = H2 * P
    Hc, Hp = H2 // 2, (H2 + 1) // 2
    Wp = (W2 + 1) // 2

    # ---- conv1 (+bias+ReLU): ONE MXU dot, K = 15*Cin, N = 3*Cout ----
    a1 = jnp.dot(lhs_ref[...], w1_ref[...], preferred_element_type=jnp.float32)
    h1w_ref[...] = jnp.maximum(a1 + b1_ref[...], 0.0).astype(h1w_ref.dtype)

    # ---- conv2 (+bias+ReLU): dx taps are pre-folded into the 3*Cout contraction dim,
    #      only the 3 dy taps remain; their offsets dy*P are sublane-aligned (P % 8 == 0).
    acc = jnp.dot(h1w_ref[0:L2, :], w2_ref[0], preferred_element_type=jnp.float32)
    acc = acc + jnp.dot(h1w_ref[P:P + L2, :], w2_ref[1],
                        preferred_element_type=jnp.float32)
    acc = acc + jnp.dot(h1w_ref[2 * P:2 * P + L2, :], w2_ref[2],
                        preferred_element_type=jnp.float32)
    h2 = jnp.maximum(acc + b2_ref[...], 0.0)                 # (L2, Cout) f32, stays in vregs
    # TODO(synk): nn.Dropout(0.5) (train mode) omitted; eval-mode identity.

    # ---- MaxPool2d(2, stride=2, ceil_mode=True), fused ----
    # Vertical half on the value: only leading-axis regroups (layout-free, P % 8 == 0).
    h2img = h2.reshape(H2, P, Cout)                          # tile-aligned sublane split
    pairs = h2img[:2 * Hc].reshape(Hc, 2, P, Cout)           # leading-dim regroup
    v = jnp.maximum(pairs[:, 0], pairs[:, 1])                # (Hc, P, Cout)
    if H2 % 2:                                               # ceil tail row: its own max
        v = jnp.concatenate([v, h2img[H2 - 1:H2]], axis=0)   # (Hp, P, Cout)
    v_ref[...] = v

    if W2 % 2:
        # Neutral right partner for the ceil-mode tail column (post-ReLU values are >= 0).
        v_ref[:, W2, :] = jnp.zeros((Hp, Cout), jnp.float32)

    # Horizontal half + lane-dense packing: column pair (2j, 2j+1) -> lanes [j*Cout, (j+1)*Cout).
    for j in range(Wp):
        pj = jnp.maximum(v_ref[:, 2 * j, :], v_ref[:, 2 * j + 1, :])   # (Hp, Cout)
        out_ref[:, j * Cout:(j + 1) * Cout] = pj.astype(out_ref.dtype)


# ----------------------------------------------------------------------------
# Wrapper: layout plumbing + pallas_call
# ----------------------------------------------------------------------------
def unet_dec_forward(params, x_nchw):
    """UNetDec forward.  x_nchw: (N, Cin, H, W) f32 -> (N, Cout, Hp, Wp) f32."""
    N, Cin, H, W = x_nchw.shape
    w1, b1, w2, b2 = params["w1"], params["b1"], params["w2"], params["b2"]
    Cout = w1.shape[-1]
    assert H >= 6 and W >= 6, "need at least 6x6 input for two valid 3x3 convs + pool"

    H1, H2, W2 = H - 2, H - 4, W - 4
    Hp, Wp = -(-H2 // 2), -(-W2 // 2)
    P = _round_up(W, 8)              # flat-row pitch: sublane-aligned dy*P conv2 offsets
    L1 = H1 * P                      # wide-conv1 flat rows
    K1 = 15 * Cin                    # 3x5 im2col contraction width
    Cw = 3 * Cout                    # wide conv1 output channels

    # Host-side 3x5 im2col (column t in [0,5), row dy in [0,3)): one XLA fusion, bf16.
    x_nhwc = jnp.transpose(x_nchw, (0, 2, 3, 1)).astype(jnp.float32)
    xpad = jnp.pad(x_nhwc, ((0, 0), (0, 0), (0, (P + 4) - W), (0, 0)))
    taps = [xpad[:, dy:dy + H1, t:t + P, :] for dy in range(3) for t in range(5)]
    lhs = jnp.concatenate(taps, axis=-1).reshape(N, L1, K1).astype(jnp.bfloat16)

    # Wide conv1 weights: output block dx computes conv1 shifted by dx columns.
    w1w = jnp.zeros((3, 5, Cin, 3, Cout), jnp.float32)
    for dx in range(3):
        w1w = w1w.at[:, dx:dx + 3, :, dx, :].set(w1)
    w1w = w1w.reshape(K1, Cw).astype(jnp.bfloat16)
    b1w = jnp.tile(b1.reshape(1, Cout), (1, 3)).astype(jnp.float32)      # (1, 3*Cout)

    # conv2 weights with dx folded into the contraction dim: (dy, dx*Cout + f, g).
    w2f = w2.reshape(3, Cw, Cout).astype(jnp.bfloat16)
    b2r = b2.reshape(1, Cout).astype(jnp.float32)

    # Padding-aware per-step VMEM budget (double-buffered blocks + resident scratch).
    vmem_bytes = (
        2 * _tile_padded_bytes((L1, K1), jnp.bfloat16)            # im2col block
        + 2 * _tile_padded_bytes((K1, Cw), jnp.bfloat16)          # w1 (resident)
        + 2 * _tile_padded_bytes((1, Cw), jnp.float32)            # b1
        + 2 * _tile_padded_bytes((3, Cw, Cout), jnp.bfloat16)     # w2 (resident)
        + 2 * _tile_padded_bytes((1, Cout), jnp.float32)          # b2
        + 2 * _tile_padded_bytes((Hp, Wp * Cout), jnp.float32)    # output block
        + _tile_padded_bytes((L1, Cw), jnp.bfloat16)              # h1w scratch
        + _tile_padded_bytes((Hp, P, Cout), jnp.float32)          # v scratch
    )
    assert vmem_bytes <= VMEM_LIMIT_BYTES // 2, (
        "TODO(synk): image too large for whole-image-per-step kernel; "
        "needs a halo-row-blocked grid", vmem_bytes)

    kernel = functools.partial(_unet_dec_kernel, H=H, W=W, P=P, Cout=Cout)

    out = pl.pallas_call(
        kernel,
        out_shape=jax.ShapeDtypeStruct((N, Hp, Wp * Cout), jnp.float32),
        grid=(N,),
        in_specs=[
            pl.BlockSpec((None, L1, K1), lambda b: (b, 0, 0)),     # per-image im2col rows
            pl.BlockSpec((K1, Cw), lambda b: (0, 0)),              # w1 wide (VMEM-resident)
            pl.BlockSpec((1, Cw), lambda b: (0, 0)),               # b1 wide
            pl.BlockSpec((3, Cw, Cout), lambda b: (0, 0, 0)),      # w2 folded (resident)
            pl.BlockSpec((1, Cout), lambda b: (0, 0)),             # b2
        ],
        out_specs=pl.BlockSpec((None, Hp, Wp * Cout), lambda b: (b, 0, 0)),
        scratch_shapes=[
            pltpu.VMEM((L1, Cw), jnp.bfloat16),      # wide conv1 activation
            pltpu.VMEM((Hp, P, Cout), jnp.float32),  # vertically-pooled conv2 rows
        ],
        compiler_params=pltpu.CompilerParams(
            dimension_semantics=("parallel",),       # megacore: split the batch across TCs
            vmem_limit_bytes=VMEM_LIMIT_BYTES,
        ),
    )(lhs, w1w, b1w, w2f, b2r)

    out = out.reshape(N, Hp, Wp, Cout)               # undo lane-dense packing (outside kernel)
    return jnp.transpose(out, (0, 3, 1, 2))          # NHWC -> NCHW


# ----------------------------------------------------------------------------
# Parameters (deterministic synthetic init, PyTorch Conv2d shapes re-laid out)
# ----------------------------------------------------------------------------
def init_params(key, in_channels, out_channels):
    k1, k2, k3, k4 = jax.random.split(key, 4)
    s1 = np.float32(np.sqrt(2.0 / (in_channels * 9)))
    s2 = np.float32(np.sqrt(2.0 / (out_channels * 9)))
    return {
        "w1": jax.random.normal(k1, (3, 3, in_channels, out_channels), jnp.float32) * s1,
        "b1": 0.01 * jax.random.normal(k2, (out_channels,), jnp.float32),
        "w2": jax.random.normal(k3, (3, 3, out_channels, out_channels), jnp.float32) * s2,
        "b2": 0.01 * jax.random.normal(k4, (out_channels,), jnp.float32),
    }


# ----------------------------------------------------------------------------
# Pure-JAX f32 reference (for validation)
# ----------------------------------------------------------------------------
def _conv3x3_relu_ref(h, w, b):
    Ho, Wo = h.shape[1] - 2, h.shape[2] - 2
    acc = jnp.zeros(h.shape[:1] + (Ho, Wo, w.shape[-1]), jnp.float32) + b
    for dy in range(3):
        for dx in range(3):
            acc = acc + jnp.einsum("nhwc,cf->nhwf",
                                   h[:, dy:dy + Ho, dx:dx + Wo, :], w[dy, dx])
    return jnp.maximum(acc, 0.0)


def _maxpool2x2_ceil_ref(h):
    N, Hh, Ww, C = h.shape
    Ho, Wo = -(-Hh // 2), -(-Ww // 2)
    hp = jnp.pad(h, ((0, 0), (0, 2 * Ho - Hh), (0, 2 * Wo - Ww), (0, 0)),
                 constant_values=-jnp.inf)
    return jnp.max(hp.reshape(N, Ho, 2, Wo, 2, C), axis=(2, 4))


def unet_dec_reference(params, x_nchw):
    x = jnp.transpose(x_nchw, (0, 2, 3, 1)).astype(jnp.float32)
    h = _conv3x3_relu_ref(x, params["w1"], params["b1"])
    h = _conv3x3_relu_ref(h, params["w2"], params["b2"])
    h = _maxpool2x2_ceil_ref(h)
    return jnp.transpose(h, (0, 3, 1, 2))


# ----------------------------------------------------------------------------
if __name__ == "__main__":
    in_channels, out_channels = 4, 32
    N, H, W = 2, 16, 16

    key = jax.random.PRNGKey(0)
    k_param, k_x = jax.random.split(key)
    params = init_params(k_param, in_channels, out_channels)
    x = jax.random.normal(k_x, (N, in_channels, H, W), jnp.float32)

    fwd = jax.jit(unet_dec_forward)
    out = jax.block_until_ready(fwd(params, x))

    Hp, Wp = -(-(H - 4) // 2), -(-(W - 4) // 2)
    assert out.shape == (N, out_channels, Hp, Wp), out.shape
    assert bool(jnp.all(jnp.isfinite(out)))

    ref = jax.jit(unet_dec_reference)(params, x)
    err = float(jnp.max(jnp.abs(out - ref)))
    scale = float(jnp.max(jnp.abs(ref))) + 1e-6
    assert err <= 0.05 * scale + 1e-3, ("mismatch vs f32 reference", err, scale)

    print("KERNEL_OK")
</pallas_src>

<mosaic_0001>
module attributes {stable_mosaic.version = 11 : i64} {
  func.func @_unet_dec_kernel(%arg0: i32, %arg1: memref<1x224x60xbf16, #tpu.memory_space<vmem>>, %arg2: memref<60x96xbf16, #tpu.memory_space<vmem>>, %arg3: memref<1x96xf32, #tpu.memory_space<vmem>>, %arg4: memref<3x96x32xbf16, #tpu.memory_space<vmem>>, %arg5: memref<1x32xf32, #tpu.memory_space<vmem>>, %arg6: memref<1x6x192xf32, #tpu.memory_space<vmem>>, %arg7: memref<224x96xbf16, #tpu.memory_space<vmem>>, %arg8: memref<6x16x32xf32, #tpu.memory_space<vmem>>) attributes {dimension_semantics = [#tpu.dimension_semantics<parallel>], iteration_bounds = array<i64: 2>, scalar_prefetch = 0 : i64, scratch_operands = 2 : i64, tpu.core_type = #tpu.core_type<tc>, window_params = [{transform_indices = @transform_0, window_bounds = array<i64: 1, 224, 60>}, {pipeline_mode = #tpu.pipeline_mode<synchronous>, transform_indices = @transform_1, window_bounds = array<i64: 60, 96>}, {pipeline_mode = #tpu.pipeline_mode<synchronous>, transform_indices = @transform_2, window_bounds = array<i64: 1, 96>}, {pipeline_mode = #tpu.pipeline_mode<synchronous>, transform_indices = @transform_3, window_bounds = array<i64: 3, 96, 32>}, {pipeline_mode = #tpu.pipeline_mode<synchronous>, transform_indices = @transform_4, window_bounds = array<i64: 1, 32>}, {transform_indices = @transform_5, window_bounds = array<i64: 1, 6, 192>}]} {
    %c0 = arith.constant 0 : index
    %c0_0 = arith.constant 0 : index
    %c0_1 = arith.constant 0 : index
    %0 = vector.load %arg1[%c0, %c0_0, %c0_1] : memref<1x224x60xbf16, #tpu.memory_space<vmem>>, vector<1x224x60xbf16>
    %1 = vector.shape_cast %0 : vector<1x224x60xbf16> to vector<224x60xbf16>
    %c0_2 = arith.constant 0 : index
    %c0_3 = arith.constant 0 : index
    %2 = vector.load %arg2[%c0_2, %c0_3] : memref<60x96xbf16, #tpu.memory_space<vmem>>, vector<60x96xbf16>
    %cst = arith.constant dense<0.000000e+00> : vector<224x96xf32>
    %3 = tpu.matmul %1, %2, %cst {dimension_numbers = #tpu.dot_dimension_numbers<[1], [0], [0], [1], [0, 0, 1, 1], [], []>} : vector<224x60xbf16>, vector<60x96xbf16>, vector<224x96xf32> -> vector<224x96xf32>
    %c0_4 = arith.constant 0 : index
    %c0_5 = arith.constant 0 : index
    %4 = vector.load %arg3[%c0_4, %c0_5] : memref<1x96xf32, #tpu.memory_space<vmem>>, vector<1x96xf32>
    %5 = vector.broadcast %4 : vector<1x96xf32> to vector<224x96xf32>
    %6 = arith.addf %3, %5 : vector<224x96xf32>
    %cst_6 = arith.constant 0.000000e+00 : f32
    %7 = vector.broadcast %cst_6 : f32 to vector<224x96xf32>
    %8 = arith.maximumf %6, %7 : vector<224x96xf32>
    %9 = arith.truncf %8 : vector<224x96xf32> to vector<224x96xbf16>
    %c0_7 = arith.constant 0 : index
    %c0_8 = arith.constant 0 : index
    %10 = vector.load %arg7[%c0_7, %c0_8] : memref<224x96xbf16, #tpu.memory_space<vmem>>, vector<224x96xbf16>
    tpu.vector_store %arg7[%c0_7, %c0_8], %9 {strides = array<i32>} : memref<224x96xbf16, #tpu.memory_space<vmem>>, vector<224x96xbf16>,
    %c0_9 = arith.constant 0 : index
    %c0_10 = arith.constant 0 : index
    %11 = vector.load %arg7[%c0_9, %c0_10] : memref<224x96xbf16, #tpu.memory_space<vmem>>, vector<192x96xbf16>
    %c0_11 = arith.constant 0 : index
    %c0_12 = arith.constant 0 : index
    %c0_13 = arith.constant 0 : index
    %12 = vector.load %arg4[%c0_11, %c0_12, %c0_13] : memref<3x96x32xbf16, #tpu.memory_space<vmem>>, vector<1x96x32xbf16>
    %13 = vector.shape_cast %12 : vector<1x96x32xbf16> to vector<96x32xbf16>
    %cst_14 = arith.constant dense<0.000000e+00> : vector<192x32xf32>
    %14 = tpu.matmul %11, %13, %cst_14 {dimension_numbers = #tpu.dot_dimension_numbers<[1], [0], [0], [1], [0, 0, 1, 1], [], []>} : vector<192x96xbf16>, vector<96x32xbf16>, vector<192x32xf32> -> vector<192x32xf32>
    %c16 = arith.constant 16 : index
    %c0_15 = arith.constant 0 : index
    %15 = vector.load %arg7[%c16, %c0_15] : memref<224x96xbf16, #tpu.memory_space<vmem>>, vector<192x96xbf16>
    %c1 = arith.constant 1 : index
    %c0_16 = arith.constant 0 : index
    %c0_17 = arith.constant 0 : index
    %16 = vector.load %arg4[%c1, %c0_16, %c0_17] : memref<3x96x32xbf16, #tpu.memory_space<vmem>>, vector<1x96x32xbf16>
    %17 = vector.shape_cast %16 : vector<1x96x32xbf16> to vector<96x32xbf16>
    %cst_18 = arith.constant dense<0.000000e+00> : vector<192x32xf32>
    %18 = tpu.matmul %15, %17, %cst_18 {dimension_numbers = #tpu.dot_dimension_numbers<[1], [0], [0], [1], [0, 0, 1, 1], [], []>} : vector<192x96xbf16>, vector<96x32xbf16>, vector<192x32xf32> -> vector<192x32xf32>
    %19 = arith.addf %14, %18 : vector<192x32xf32>
    %c32 = arith.constant 32 : index
    %c0_19 = arith.constant 0 : index
    %20 = vector.load %arg7[%c32, %c0_19] : memref<224x96xbf16, #tpu.memory_space<vmem>>, vector<192x96xbf16>
    %c2 = arith.constant 2 : index
    %c0_20 = arith.constant 0 : index
    %c0_21 = arith.constant 0 : index
    %21 = vector.load %arg4[%c2, %c0_20, %c0_21] : memref<3x96x32xbf16, #tpu.memory_space<vmem>>, vector<1x96x32xbf16>
    %22 = vector.shape_cast %21 : vector<1x96x32xbf16> to vector<96x32xbf16>
    %cst_22 = arith.constant dense<0.000000e+00> : vector<192x32xf32>
    %23 = tpu.matmul %20, %22, %cst_22 {dimension_numbers = #tpu.dot_dimension_numbers<[1], [0], [0], [1], [0, 0, 1, 1], [], []>} : vector<192x96xbf16>, vector<96x32xbf16>, vector<192x32xf32> -> vector<192x32xf32>
    %24 = arith.addf %19, %23 : vector<192x32xf32>
    %c0_23 = arith.constant 0 : index
    %c0_24 = arith.constant 0 : index
    %25 = vector.load %arg5[%c0_23, %c0_24] : memref<1x32xf32, #tpu.memory_space<vmem>>, vector<1x32xf32>
    %26 = vector.broadcast %25 : vector<1x32xf32> to vector<192x32xf32>
    %27 = arith.addf %24, %26 : vector<192x32xf32>
    %cst_25 = arith.constant 0.000000e+00 : f32
    %28 = vector.broadcast %cst_25 : f32 to vector<192x32xf32>
    %29 = arith.maximumf %27, %28 : vector<192x32xf32>
    %30 = vector.shape_cast %29 : vector<192x32xf32> to vector<12x16x32xf32>
    %31 = vector.shape_cast %30 : vector<12x16x32xf32> to vector<6x2x16x32xf32>
    %32 = vector.extract_strided_slice %31 {offsets = [0, 0, 0, 0], sizes = [6, 1, 16, 32], strides = [1, 1, 1, 1]} : vector<6x2x16x32xf32> to vector<6x1x16x32xf32>
    %33 = vector.shape_cast %32 : vector<6x1x16x32xf32> to vector<6x16x32xf32>
    %34 = vector.extract_strided_slice %31 {offsets = [0, 1, 0, 0], sizes = [6, 1, 16, 32], strides = [1, 1, 1, 1]} : vector<6x2x16x32xf32> to vector<6x1x16x32xf32>
    %35 = vector.shape_cast %34 : vector<6x1x16x32xf32> to vector<6x16x32xf32>
    %36 = arith.maximumf %33, %35 : vector<6x16x32xf32>
    %c0_26 = arith.constant 0 : index
    %c0_27 = arith.constant 0 : index
    %c0_28 = arith.constant 0 : index
    %37 = vector.load %arg8[%c0_26, %c0_27, %c0_28] : memref<6x16x32xf32, #tpu.memory_space<vmem>>, vector<6x16x32xf32>
    tpu.vector_store %arg8[%c0_26, %c0_27, %c0_28], %36 {strides = array<i32>} : memref<6x16x32xf32, #tpu.memory_space<vmem>>, vector<6x16x32xf32>,
    %c0_29 = arith.constant 0 : index
    %c0_30 = arith.constant 0 : index
    %c0_31 = arith.constant 0 : index
    %38 = vector.load %arg8[%c0_29, %c0_30, %c0_31] : memref<6x16x32xf32, #tpu.memory_space<vmem>>, vector<6x1x32xf32>
    %39 = vector.shape_cast %38 : vector<6x1x32xf32> to vector<6x32xf32>
    %c0_32 = arith.constant 0 : index
    %c1_33 = arith.constant 1 : index
    %c0_34 = arith.constant 0 : index
    %40 = vector.load %arg8[%c0_32, %c1_33, %c0_34] : memref<6x16x32xf32, #tpu.memory_space<vmem>>, vector<6x1x32xf32>
    %41 = vector.shape_cast %40 : vector<6x1x32xf32> to vector<6x32xf32>
    %42 = arith.maximumf %39, %41 : vector<6x32xf32>
    %c0_35 = arith.constant 0 : index
    %c0_36 = arith.constant 0 : index
    %c0_37 = arith.constant 0 : index
    %43 = vector.load %arg6[%c0_35, %c0_36, %c0_37] : memref<1x6x192xf32, #tpu.memory_space<vmem>>, vector<1x6x32xf32>
    %44 = vector.shape_cast %43 : vector<1x6x32xf32> to vector<6x32xf32>
    %45 = vector.shape_cast %42 : vector<6x32xf32> to vector<1x6x32xf32>
    tpu.vector_store %arg6[%c0_35, %c0_36, %c0_37], %45 {strides = array<i32>} : memref<1x6x192xf32, #tpu.memory_space<vmem>>, vector<1x6x32xf32>,
    %c0_38 = arith.constant 0 : index
    %c2_39 = arith.constant 2 : index
    %c0_40 = arith.constant 0 : index
    %46 = vector.load %arg8[%c0_38, %c2_39, %c0_40] : memref<6x16x32xf32, #tpu.memory_space<vmem>>, vector<6x1x32xf32>
    %47 = vector.shape_cast %46 : vector<6x1x32xf32> to vector<6x32xf32>
    %c0_41 = arith.constant 0 : index
    %c3 = arith.constant 3 : index
    %c0_42 = arith.constant 0 : index
    %48 = vector.load %arg8[%c0_41, %c3, %c0_42] : memref<6x16x32xf32, #tpu.memory_space<vmem>>, vector<6x1x32xf32>
    %49 = vector.shape_cast %48 : vector<6x1x32xf32> to vector<6x32xf32>
    %50 = arith.maximumf %47, %49 : vector<6x32xf32>
    %c0_43 = arith.constant 0 : index
    %c0_44 = arith.constant 0 : index
    %c32_45 = arith.constant 32 : index
    %51 = vector.load %arg6[%c0_43, %c0_44, %c32_45] : memref<1x6x192xf32, #tpu.memory_space<vmem>>, vector<1x6x32xf32>
    %52 = vector.shape_cast %51 : vector<1x6x32xf32> to vector<6x32xf32>
    %53 = vector.shape_cast %50 : vector<6x32xf32> to vector<1x6x32xf32>
    tpu.vector_store %arg6[%c0_43, %c0_44, %c32_45], %53 {strides = array<i32>} : memref<1x6x192xf32, #tpu.memory_space<vmem>>, vector<1x6x32xf32>,
    %c0_46 = arith.constant 0 : index
    %c4 = arith.constant 4 : index
    %c0_47 = arith.constant 0 : index
    %54 = vector.load %arg8[%c0_46, %c4, %c0_47] : memref<6x16x32xf32, #tpu.memory_space<vmem>>, vector<6x1x32xf32>
    %55 = vector.shape_cast %54 : vector<6x1x32xf32> to vector<6x32xf32>
    %c0_48 = arith.constant 0 : index
    %c5 = arith.constant 5 : index
    %c0_49 = arith.constant 0 : index
    %56 = vector.load %arg8[%c0_48, %c5, %c0_49] : memref<6x16x32xf32, #tpu.memory_space<vmem>>, vector<6x1x32xf32>
    %57 = vector.shape_cast %56 : vector<6x1x32xf32> to vector<6x32xf32>
    %58 = arith.maximumf %55, %57 : vector<6x32xf32>
    %c0_50 = arith.constant 0 : index
    %c0_51 = arith.constant 0 : index
    %c64 = arith.constant 64 : index
    %59 = vector.load %arg6[%c0_50, %c0_51, %c64] : memref<1x6x192xf32, #tpu.memory_space<vmem>>, vector<1x6x32xf32>
    %60 = vector.shape_cast %59 : vector<1x6x32xf32> to vector<6x32xf32>
    %61 = vector.shape_cast %58 : vector<6x32xf32> to vector<1x6x32xf32>
    tpu.vector_store %arg6[%c0_50, %c0_51, %c64], %61 {strides = array<i32>} : memref<1x6x192xf32, #tpu.memory_space<vmem>>, vector<1x6x32xf32>,
    %c0_52 = arith.constant 0 : index
    %c6 = arith.constant 6 : index
    %c0_53 = arith.constant 0 : index
    %62 = vector.load %arg8[%c0_52, %c6, %c0_53] : memref<6x16x32xf32, #tpu.memory_space<vmem>>, vector<6x1x32xf32>
    %63 = vector.shape_cast %62 : vector<6x1x32xf32> to vector<6x32xf32>
    %c0_54 = arith.constant 0 : index
    %c7 = arith.constant 7 : index
    %c0_55 = arith.constant 0 : index
    %64 = vector.load %arg8[%c0_54, %c7, %c0_55] : memref<6x16x32xf32, #tpu.memory_space<vmem>>, vector<6x1x32xf32>
    %65 = vector.shape_cast %64 : vector<6x1x32xf32> to vector<6x32xf32>
    %66 = arith.maximumf %63, %65 : vector<6x32xf32>
    %c0_56 = arith.constant 0 : index
    %c0_57 = arith.constant 0 : index
    %c96 = arith.constant 96 : index
    %67 = vector.load %arg6[%c0_56, %c0_57, %c96] : memref<1x6x192xf32, #tpu.memory_space<vmem>>, vector<1x6x32xf32>
    %68 = vector.shape_cast %67 : vector<1x6x32xf32> to vector<6x32xf32>
    %69 = vector.shape_cast %66 : vector<6x32xf32> to vector<1x6x32xf32>
    tpu.vector_store %arg6[%c0_56, %c0_57, %c96], %69 {strides = array<i32>} : memref<1x6x192xf32, #tpu.memory_space<vmem>>, vector<1x6x32xf32>,
    %c0_58 = arith.constant 0 : index
    %c8 = arith.constant 8 : index
    %c0_59 = arith.constant 0 : index
    %70 = vector.load %arg8[%c0_58, %c8, %c0_59] : memref<6x16x32xf32, #tpu.memory_space<vmem>>, vector<6x1x32xf32>
    %71 = vector.shape_cast %70 : vector<6x1x32xf32> to vector<6x32xf32>
    %c0_60 = arith.constant 0 : index
    %c9 = arith.constant 9 : index
    %c0_61 = arith.constant 0 : index
    %72 = vector.load %arg8[%c0_60, %c9, %c0_61] : memref<6x16x32xf32, #tpu.memory_space<vmem>>, vector<6x1x32xf32>
    %73 = vector.shape_cast %72 : vector<6x1x32xf32> to vector<6x32xf32>
    %74 = arith.maximumf %71, %73 : vector<6x32xf32>
    %c0_62 = arith.constant 0 : index
    %c0_63 = arith.constant 0 : index
    %c128 = arith.constant 128 : index
    %75 = vector.load %arg6[%c0_62, %c0_63, %c128] : memref<1x6x192xf32, #tpu.memory_space<vmem>>, vector<1x6x32xf32>
    %76 = vector.shape_cast %75 : vector<1x6x32xf32> to vector<6x32xf32>
    %77 = vector.shape_cast %74 : vector<6x32xf32> to vector<1x6x32xf32>
    tpu.vector_store %arg6[%c0_62, %c0_63, %c128], %77 {strides = array<i32>} : memref<1x6x192xf32, #tpu.memory_space<vmem>>, vector<1x6x32xf32>,
    %c0_64 = arith.constant 0 : index
    %c10 = arith.constant 10 : index
    %c0_65 = arith.constant 0 : index
    %78 = vector.load %arg8[%c0_64, %c10, %c0_65] : memref<6x16x32xf32, #tpu.memory_space<vmem>>, vector<6x1x32xf32>
    %79 = vector.shape_cast %78 : vector<6x1x32xf32> to vector<6x32xf32>
    %c0_66 = arith.constant 0 : index
    %c11 = arith.constant 11 : index
    %c0_67 = arith.constant 0 : index
    %80 = vector.load %arg8[%c0_66, %c11, %c0_67] : memref<6x16x32xf32, #tpu.memory_space<vmem>>, vector<6x1x32xf32>
    %81 = vector.shape_cast %80 : vector<6x1x32xf32> to vector<6x32xf32>
    %82 = arith.maximumf %79, %81 : vector<6x32xf32>
    %c0_68 = arith.constant 0 : index
    %c0_69 = arith.constant 0 : index
    %c160 = arith.constant 160 : index
    %83 = vector.load %arg6[%c0_68, %c0_69, %c160] : memref<1x6x192xf32, #tpu.memory_space<vmem>>, vector<1x6x32xf32>
    %84 = vector.shape_cast %83 : vector<1x6x32xf32> to vector<6x32xf32>
    %85 = vector.shape_cast %82 : vector<6x32xf32> to vector<1x6x32xf32>
    tpu.vector_store %arg6[%c0_68, %c0_69, %c160], %85 {strides = array<i32>} : memref<1x6x192xf32, #tpu.memory_space<vmem>>, vector<1x6x32xf32>,
    return
  }
  func.func @transform_0(%arg0: i32) -> (i32, i32, i32) {
    %c0_i32 = arith.constant 0 : i32
    %c0_i32_0 = arith.constant 0 : i32
    %c0_i32_1 = arith.constant 0 : i32
    return %arg0, %c0_i32, %c0_i32_0 : i32, i32, i32
  }
  func.func @transform_1(%arg0: i32) -> (i32, i32) {
    %c0_i32 = arith.constant 0 : i32
    %c0_i32_0 = arith.constant 0 : i32
    %c0_i32_1 = arith.constant 0 : i32
    return %c0_i32, %c0_i32_0 : i32, i32
  }
  func.func @transform_2(%arg0: i32) -> (i32, i32) {
    %c0_i32 = arith.constant 0 : i32
    %c0_i32_0 = arith.constant 0 : i32
    %c0_i32_1 = arith.constant 0 : i32
    return %c0_i32, %c0_i32_0 : i32, i32
  }
  func.func @transform_3(%arg0: i32) -> (i32, i32, i32) {
    %c0_i32 = arith.constant 0 : i32
    %c0_i32_0 = arith.constant 0 : i32
    %c0_i32_1 = arith.constant 0 : i32
    %c0_i32_2 = arith.constant 0 : i32
    return %c0_i32, %c0_i32_0, %c0_i32_1 : i32, i32, i32
  }
  func.func @transform_4(%arg0: i32) -> (i32, i32) {
    %c0_i32 = arith.constant 0 : i32
    %c0_i32_0 = arith.constant 0 : i32
    %c0_i32_1 = arith.constant 0 : i32
    return %c0_i32, %c0_i32_0 : i32, i32
  }
  func.func @transform_5(%arg0: i32) -> (i32, i32, i32) {
    %c0_i32 = arith.constant 0 : i32
    %c0_i32_0 = arith.constant 0 : i32
    %c0_i32_1 = arith.constant 0 : i32
    return %arg0, %c0_i32, %c0_i32_0 : i32, i32, i32
  }
}

</mosaic_0001>

<bundles_post_ra>
// kernel: unet_dec_forward.1
= control target key start
LH: loop header
LB: loop body
LE: loop exit
PB: predicated region body
PF: predicated region fallthrough
CT: control target
= control target key end

     0   :  { %s2008_s18 = smov 0   ;;  %s2385_s0 = inlined_call_operand.vmem [shape: bf16[2,224,60], index: 0, kind: input, shape index: {}]   ;;  %s2386_s1 = inlined_call_operand.vmem [shape: bf16[60,96], index: 1, kind: input, shape index: {}]   ;;  %s2387_s2 = inlined_call_operand.vmem [shape: f32[1,96], index: 2, kind: input, shape index: {}]   ;;  %s2388_s3 = inlined_call_operand.vmem [shape: bf16[3,96,32], index: 3, kind: input, shape index: {}]   ;;  %s2389_s4 = inlined_call_operand.vmem [shape: f32[1,32], index: 4, kind: input, shape index: {}]   ;;  %s2390_s5 = inlined_call_operand.vmem [shape: f32[2,6,192], index: 5, kind: output, shape index: {}]  }
   0x1 LB: > { %s1563_s19 = sadd.s32 4294967295, %s1973_s18   ;;  %p1567_p0 = scmp.ge.s32.totalorder %s1973_s18, 1  ;;  %s1973_s18 = sphi %s2008_s18, %s15_s18  }
   0x2   : > { %p187_p1 = scmp.lt.s32.totalorder %s1973_s18, 3 }
   0x4   : > { %p188_p2 = pnand %p1567_p0, %p187_p1 }
   0x5   : > { %p215_p3 = scmp.lt.s32.totalorder (!%p188_p2), %s1563_s19, 1  ;;  %s1975_s7 = smov (!%p188_p2), 96  }
   0x6   : > { %191 = sbr.rel (%p188_p2) target bundleno = 666 (0x29a), region = 40  ;;  %s1977_s9 = smov (!%p188_p2), 64  }
   0xb   : > { %v1641_v0 = vld [vmem:[%s2386_s1 + $0x18] sm:$0xf]  ;;  %v1909_v1 = vld [vmem:[%s2386_s1 + $0x18] sm:$0x30]  ;;  %vm402_vm0 = vcmask 1045504   ;;  %v1908_v4 = vld [vmem:[%s2386_s1 + $0x10] sm:$0xff] }
   0xc   : > { %v1642_v2 = vor.u32 %v1909_v1, %v1641_v0  ;;  %s2392_s19 = smov (!%p215_p3, %s1563_s19), 1  ;;  %v1907_v5 = vld [vmem:[%s2386_s1 + $0x8] sm:$0xff]  ;;  %v1906_v6 = vld [vmem:[%s2386_s1] sm:$0xff]  ;;  %vm359_vm1 = vcmask 490496   ;;  %v1925_v16 = vld [vmem:[%s2388_s3 + $0x18] sm:$0xff]  ;;  %vm541_vm2 = vcmask 781312  }
   0xd   : > { %s1953_s28 = smul.u32 112, %s2392_s19  ;;  %v1927_v14 = vld [vmem:[%s2388_s3 + $0x28] sm:$0xff]  ;;  %v1926_v15 = vld [vmem:[%s2388_s3 + $0x20] sm:$0xff]  ;;  %v1924_v17 = vld [vmem:[%s2388_s3 + $0x10] sm:$0xff]  ;;  %vm717_vm3 = vcmask 785408   ;;  %vm1262_vm4 = vcmask 261120  }
   0xe   : > { %v404_v3 = vsel %vm402_vm0, %v1642_v2, 0  ;;  %869 = vmatpush.bf16.msra.mxu2 %v1927_v14  ;;  %v1934_v19 = vld [vmem:[%s2388_s3 + $0x58] sm:$0xff]  ;;  %v1923_v20 = vld [vmem:[%s2388_s3 + $0x8] sm:$0xff]  ;;  %v1933_v21 = vld [vmem:[%s2388_s3 + $0x50] sm:$0xff]  ;;  %vm1300_vm5 = vcmask 1041409   ;;  %vm1303_vm6 = vcmask 1042434  }
   0xf   : > { %410 = vmatpush.bf16.msra.mxu0 %v404_v3  ;;  %s2037_s8 = scalar_lea.vmem %s2385_s0, %s1953_s28  ;;  %756 = vmatpush.bf16.msra.mxu1 %v1934_v19  ;;  %v1922_v22 = vld [vmem:[%s2388_s3] sm:$0xff]  ;;  %v1932_v23 = vld [vmem:[%s2388_s3 + $0x48] sm:$0xff]  ;;  %v1930_v27 = vld [vmem:[%s2388_s3 + $0x38] sm:$0xff]  ;;  %vm1306_vm7 = vcmask 1043459   ;;  %s1891_s28 = sshll.u32 %s2392_s19, 4  ;;  %vm1309_vm8 = vcmask 1044484  }
  0x10   : > { %v1892_v7 = vld [vmem:[%s2037_s8] sm:$0xff]  ;;  %v1893_v8 = vld [vmem:[%s2037_s8 + $0x8] sm:$0xff]  ;;  %v1894_v9 = vld [vmem:[%s2037_s8 + $0x10] sm:$0xff]  ;;  %vm1312_vm9 = vcmask 1045509   ;;  %s2343_s6 = scalar_lea.vmem %s2390_s5, %s1891_s28  ;;  %vm1315_vm10 = vcmask 259072   ;;  %s1976_s19 = smov 32  }
  0x11   : > { %v1895_v10 = vld [vmem:[%s2037_s8 + $0x18] sm:$0xff]  ;;  %v1896_v11 = vld [vmem:[%s2037_s8 + $0x20] sm:$0xff]  ;;  %v1897_v12 = vld [vmem:[%s2037_s8 + $0x28] sm:$0xff]  ;;  %vm1354_vm11 = vcmask 521472   ;;  %vm1393_vm12 = vcmask 783872   ;;  %vm1432_vm13 = vcmask 1046272  }
  0x12   : > { %v1898_v13 = vld [vmem:[%s2037_s8 + $0x30] sm:$0xff]  ;;  %870 = vmatpush.bf16.msra.mxu2 %v1926_v15  ;;  %v1899_v18 = vld [vmem:[%s2037_s8 + $0x38] sm:$0xff]  ;;  %v1931_v24 = vld [vmem:[%s2388_s3 + $0x40] sm:$0xff] }
  0x13   : > { %411 = vmatpush.bf16.msra.mxu0 %v1908_v4  ;;  %757 = vmatpush.bf16.msra.mxu1 %v1933_v21  ;;  %v2088_v25 = vld [vmem:[%s2387_s2] ss:$0 sm:$0xff]  ;;  %v1952_v28 = vld [vmem:[%s2388_s3 + $0x88] sm:$0xff]  ;;  %v1929_v32 = vld [vmem:[%s2388_s3 + $0x30] sm:$0xff] }
  0x14   : > { %v1900_v26 = vld [vmem:[%s2037_s8 + $0x40] sm:$0xff]  ;;  %1107 = vmatpush.bf16.msra.mxu3 %v1952_v28  ;;  %v1950_v35 = vld [vmem:[%s2388_s3 + $0x78] sm:$0xff]  ;;  %v1949_v39 = vld [vmem:[%s2388_s3 + $0x70] sm:$0xff] }
  0x15   : > { %v1951_v33 = vld [vmem:[%s2388_s3 + $0x80] sm:$0xff]  ;;  %v1901_v41 = vld [vmem:[%s2037_s8 + $0x48] sm:$0xff]  ;;  %v1902_v53 = vld [vmem:[%s2037_s8 + $0x50] sm:$0xff] }
  0x16   : > { %871 = vmatpush.bf16.msra.mxu2 %v1925_v16  ;;  %v1948_v42 = vld [vmem:[%s2388_s3 + $0x68] sm:$0xff]  ;;  %v1947_v46 = vld [vmem:[%s2388_s3 + $0x60] sm:$0xff]  ;;  %v1903_v63 = vld [vmem:[%s2037_s8 + $0x58] sm:$0xff] }
  0x17   : > { %412 = vmatpush.bf16.msra.mxu0 %v1907_v5  ;;  %758 = vmatpush.bf16.msra.mxu1 %v1932_v23  ;;  %v1905_v21 = vld [vmem:[%s2037_s8 + $0x68] sm:$0xff] }
  0x18   : > { %1108 = vmatpush.bf16.msra.mxu3 %v1951_v33 }
  0x1a   : > { %872 = vmatpush.bf16.msra.mxu2 %v1924_v17 }
  0x1b   : > { %413 = vmatpush.bf16.msra.mxu0 %v1906_v6  ;;  %759 = vmatpush.bf16.msra.mxu1 %v1931_v24 }
  0x1c   : > { %1109 = vmatpush.bf16.msra.mxu3 %v1950_v35 }
  0x1e   : > { %1643 = vmatmul.msk.bf16.vlgmr.msra.gmra.mxu0 %vm359_vm1, %v1892_v7  ;;  %873 = vmatpush.bf16.msra.mxu2 %v1923_v20 }
  0x1f   : > { %760 = vmatpush.bf16.msra.mxu1 %v1930_v27 }
  0x20   : > { %1110 = vmatpush.bf16.msra.mxu3 %v1949_v39 }
  0x22   : > { %874 = vmatpush.bf16.msra.mxu2 %v1922_v22 }
  0x23   : > { %761 = vmatpush.bf16.msra.mxu1 %v1929_v32 }
  0x24   : > { %1111 = vmatpush.bf16.msra.mxu3 %v1948_v42 }
  0x28   : > { %1112 = vmatpush.bf16.msra.mxu3 %v1947_v46 }
  0x2e   : > { %1644 = vmatmul.msk.bf16.gmra.mxu0 %vm359_vm1, %v1893_v8 }
  0x3e   : > { %1645 = vmatmul.msk.bf16.gmra.mxu0 %vm359_vm1, %v1894_v9 }
  0x4e   : > { %1646 = vmatmul.msk.bf16.gmra.mxu0 %vm359_vm1, %v1895_v10  ;;  %v1904_v10 = vld [vmem:[%s2037_s8 + $0x60] sm:$0xff] }
  0x5e   : > { %1647 = vmatmul.msk.bf16.gmra.mxu0 %vm359_vm1, %v1896_v11 }
  0x6e   : > { %1648 = vmatmul.msk.bf16.gmra.mxu0 %vm359_vm1, %v1897_v12 }
  0x7e   : > { %1649 = vmatmul.msk.bf16.gmra.mxu0 %vm359_vm1, %v1898_v13 }
  0x8e   : > { %1650 = vmatmul.msk.bf16.gmra.mxu0 %vm359_vm1, %v1899_v18 }
  0x9b   : > { %v415_v29 = vpop.f32.mrf.mxu0 }
  0x9c   : > { %v416_v30 = vadd.f32 %v2088_v25, %v415_v29 }
  0x9e   : > { %v485_v31 = vmax.f32 %v416_v30, 0.0  ;;  %1651 = vmatmul.msk.bf16.gmra.mxu0 %vm359_vm1, %v1900_v26 }
  0xa0   : > { %v513_v34 = vpack.c.bf16 %v485_v31, %v485_v31 }
  0xa2   : > { %542 = vst.msk [vmem:[#allocation2] sm:$0xf] %vm541_vm2, %v513_v34 }
  0xa3   : > { %v417_v36 = vpop.f32.mrf.mxu0 }
  0xa4   : > { %v418_v37 = vadd.f32 %v2088_v25, %v417_v36 }
  0xa6   : > { %v486_v38 = vmax.f32 %v418_v37, 0.0 }
  0xa8   : > { %v514_v40 = vpack.c.bf16 %v486_v38, %v486_v38 }
  0xaa   : > { %543 = vst.msk [vmem:[#allocation2 + $0x4] sm:$0xf] %vm541_vm2, %v514_v40 }
  0xab   : > { %v420_v43 = vpop.f32.mrf.mxu0 }
  0xac   : > { %v421_v44 = vadd.f32 %v2088_v25, %v420_v43 }
  0xae   : > { %v487_v45 = vmax.f32 %v421_v44, 0.0  ;;  %1652 = vmatmul.msk.bf16.gmra.mxu0 %vm359_vm1, %v1901_v41 }
  0xb0   : > { %v515_v47 = vpack.c.bf16 %v487_v45, %v487_v45 }
  0xb1   : > { %v1910_v48 = vld [vmem:[#allocation2] sm:$0xff] }
  0xb2   : > { %544 = vst.msk [vmem:[#allocation2 + $0x8] sm:$0xf] %vm541_vm2, %v515_v47  ;;  %1781 = vmatmul.msk.bf16.vlgmr.msra.gmra.mxu2 %vm717_vm3, %v1910_v48 }
  0xb3   : > { %v422_v49 = vpop.f32.mrf.mxu0 }
  0xb4   : > { %v423_v50 = vadd.f32 %v2088_v25, %v422_v49 }
  0xb6   : > { %v488_v51 = vmax.f32 %v423_v50, 0.0 }
  0xb8   : > { %v516_v52 = vpack.c.bf16 %v488_v51, %v488_v51 }
  0xba   : > { %545 = vst.msk [vmem:[#allocation2 + $0xc] sm:$0xf] %vm541_vm2, %v516_v52 }
  0xbb   : > { %v425_v54 = vpop.f32.mrf.mxu0 }
  0xbc   : > { %v426_v55 = vadd.f32 %v2088_v25, %v425_v54 }
  0xbe   : > { %v489_v56 = vmax.f32 %v426_v55, 0.0  ;;  %1653 = vmatmul.msk.bf16.gmra.mxu0 %vm359_vm1, %v1902_v53 }
  0xc0   : > { %v517_v57 = vpack.c.bf16 %v489_v56, %v489_v56 }
  0xc1   : > { %v1911_v58 = vld [vmem:[#allocation2 + $0x8] sm:$0xff] }
  0xc2   : > { %546 = vst.msk [vmem:[#allocation2 + $0x10] sm:$0xf] %vm541_vm2, %v517_v57  ;;  %1741 = vmatmul.msk.bf16.vlgmr.msra.gmra.mxu1 %vm717_vm3, %v1911_v58  ;;  %1782 = vmatmul.msk.bf16.gmra.mxu2 %vm717_vm3, %v1911_v58 }
  0xc3   : > { %v427_v59 = vpop.f32.mrf.mxu0 }
  0xc4   : > { %v428_v60 = vadd.f32 %v2088_v25, %v427_v59 }
  0xc6   : > { %v490_v61 = vmax.f32 %v428_v60, 0.0 }
  0xc8   : > { %v518_v62 = vpack.c.bf16 %v490_v61, %v490_v61 }
  0xca   : > { %547 = vst.msk [vmem:[#allocation2 + $0x14] sm:$0xf] %vm541_vm2, %v518_v62 }
  0xcb   : > { %v430_v0 = vpop.f32.mrf.mxu0 }
  0xcc   : > { %v431_v1 = vadd.f32 %v2088_v25, %v430_v0 }
  0xce   : > { %v491_v2 = vmax.f32 %v431_v1, 0.0  ;;  %1654 = vmatmul.msk.bf16.gmra.mxu0 %vm359_vm1, %v1903_v63 }
  0xd0   : > { %v519_v3 = vpack.c.bf16 %v491_v2, %v491_v2 }
  0xd1   : > { %v1912_v4 = vld [vmem:[#allocation2 + $0x10] sm:$0xff] }
  0xd2   : > { %v1935_v5 = vld [vmem:[#allocation2 + $0x10] sm:$0xff]  ;;  %548 = vst.msk [vmem:[#allocation2 + $0x18] sm:$0xf] %vm541_vm2, %v519_v3  ;;  %1742 = vmatmul.msk.bf16.gmra.mxu1 %vm717_vm3, %v1912_v4  ;;  %1783 = vmatmul.msk.bf16.gmra.mxu2 %vm717_vm3, %v1912_v4 }
  0xd3   : > { %v432_v6 = vpop.f32.mrf.mxu0  ;;  %1877 = vmatmul.msk.bf16.vlgmr.msra.gmra.mxu3 %vm717_vm3, %v1935_v5 }
  0xd4   : > { %v433_v7 = vadd.f32 %v2088_v25, %v432_v6 }
  0xd6   : > { %v492_v8 = vmax.f32 %v433_v7, 0.0 }
  0xd8   : > { %v520_v9 = vpack.c.bf16 %v492_v8, %v492_v8 }
  0xda   : > { %549 = vst.msk [vmem:[#allocation2 + $0x1c] sm:$0xf] %vm541_vm2, %v520_v9 }
  0xdb   : > { %v435_v11 = vpop.f32.mrf.mxu0 }
  0xdc   : > { %v436_v12 = vadd.f32 %v2088_v25, %v435_v11 }
  0xde   : > { %v493_v13 = vmax.f32 %v436_v12, 0.0  ;;  %1655 = vmatmul.msk.bf16.gmra.mxu0 %vm359_vm1, %v1904_v10 }
  0xe0   : > { %v521_v14 = vpack.c.bf16 %v493_v13, %v493_v13 }
  0xe1   : > { %v1913_v15 = vld [vmem:[#allocation2 + $0x18] sm:$0xff] }
  0xe2   : > { %v1936_v16 = vld [vmem:[#allocation2 + $0x18] sm:$0xff]  ;;  %550 = vst.msk [vmem:[#allocation2 + $0x20] sm:$0xf] %vm541_vm2, %v521_v14  ;;  %1743 = vmatmul.msk.bf16.gmra.mxu1 %vm717_vm3, %v1913_v15  ;;  %1784 = vmatmul.msk.bf16.gmra.mxu2 %vm717_vm3, %v1913_v15 }
  0xe3   : > { %v437_v17 = vpop.f32.mrf.mxu0  ;;  %1878 = vmatmul.msk.bf16.gmra.mxu3 %vm717_vm3, %v1936_v16 }
  0xe4   : > { %v438_v18 = vadd.f32 %v2088_v25, %v437_v17 }
  0xe6   : > { %v494_v19 = vmax.f32 %v438_v18, 0.0 }
  0xe8   : > { %v522_v20 = vpack.c.bf16 %v494_v19, %v494_v19 }
  0xea   : > { %551 = vst.msk [vmem:[#allocation2 + $0x24] sm:$0xf] %vm541_vm2, %v522_v20 }
  0xeb   : > { %v440_v22 = vpop.f32.mrf.mxu0 }
  0xec   : > { %v441_v23 = vadd.f32 %v2088_v25, %v440_v22 }
  0xee   : > { %v495_v24 = vmax.f32 %v441_v23, 0.0  ;;  %1656 = vmatmul.msk.bf16.gmra.mxu0 %vm359_vm1, %v1905_v21 }
  0xf0   : > { %v523_v26 = vpack.c.bf16 %v495_v24, %v495_v24 }
  0xf1   : > { %v1914_v27 = vld [vmem:[#allocation2 + $0x20] sm:$0xff] }
  0xf2   : > { %v1937_v28 = vld [vmem:[#allocation2 + $0x20] sm:$0xff]  ;;  %552 = vst.msk [vmem:[#allocation2 + $0x28] sm:$0xf] %vm541_vm2, %v523_v26  ;;  %1744 = vmatmul.msk.bf16.gmra.mxu1 %vm717_vm3, %v1914_v27  ;;  %1785 = vmatmul.msk.bf16.gmra.mxu2 %vm717_vm3, %v1914_v27 }
  0xf3   : > { %v442_v29 = vpop.f32.mrf.mxu0  ;;  %1879 = vmatmul.msk.bf16.gmra.mxu3 %vm717_vm3, %v1937_v28 }
  0xf4   : > { %v443_v30 = vadd.f32 %v2088_v25, %v442_v29 }
  0xf6   : > { %v496_v31 = vmax.f32 %v443_v30, 0.0 }
  0xf8   : > { %v524_v32 = vpack.c.bf16 %v496_v31, %v496_v31 }
  0xfa   : > { %553 = vst.msk [vmem:[#allocation2 + $0x2c] sm:$0xf] %vm541_vm2, %v524_v32 }
  0xfb   : > { %v445_v33 = vpop.f32.mrf.mxu0 }
  0xfc   : > { %v446_v34 = vadd.f32 %v2088_v25, %v445_v33 }
  0xfe   : > { %v497_v35 = vmax.f32 %v446_v34, 0.0 }
 0x100   : > { %v525_v36 = vpack.c.bf16 %v497_v35, %v497_v35 }
 0x101   : > { %v1915_v37 = vld [vmem:[#allocation2 + $0x28] sm:$0xff] }
 0x102   : > { %v1938_v38 = vld [vmem:[#allocation2 + $0x28] sm:$0xff]  ;;  %554 = vst.msk [vmem:[#allocation2 + $0x30] sm:$0xf] %vm541_vm2, %v525_v36  ;;  %1745 = vmatmul.msk.bf16.gmra.mxu1 %vm717_vm3, %v1915_v37  ;;  %1786 = vmatmul.msk.bf16.gmra.mxu2 %vm717_vm3, %v1915_v37 }
 0x103   : > { %v447_v39 = vpop.f32.mrf.mxu0  ;;  %1880 = vmatmul.msk.bf16.gmra.mxu3 %vm717_vm3, %v1938_v38 }
 0x104   : > { %v448_v40 = vadd.f32 %v2088_v25, %v447_v39 }
 0x106   : > { %v498_v41 = vmax.f32 %v448_v40, 0.0 }
 0x108   : > { %v526_v42 = vpack.c.bf16 %v498_v41, %v498_v41 }
 0x10a   : > { %555 = vst.msk [vmem:[#allocation2 + $0x34] sm:$0xf] %vm541_vm2, %v526_v42 }
 0x10b   : > { %v450_v43 = vpop.f32.mrf.mxu0 }
 0x10c   : > { %v451_v44 = vadd.f32 %v2088_v25, %v450_v43 }
 0x10e   : > { %v499_v45 = vmax.f32 %v451_v44, 0.0 }
 0x110   : > { %v527_v46 = vpack.c.bf16 %v499_v45, %v499_v45 }
 0x111   : > { %v1916_v47 = vld [vmem:[#allocation2 + $0x30] sm:$0xff] }
 0x112   : > { %v1939_v48 = vld [vmem:[#allocation2 + $0x30] sm:$0xff]  ;;  %556 = vst.msk [vmem:[#allocation2 + $0x38] sm:$0xf] %vm541_vm2, %v527_v46  ;;  %1746 = vmatmul.msk.bf16.gmra.mxu1 %vm717_vm3, %v1916_v47  ;;  %1787 = vmatmul.msk.bf16.gmra.mxu2 %vm717_vm3, %v1916_v47 }
 0x113   : > { %v452_v49 = vpop.f32.mrf.mxu0  ;;  %1881 = vmatmul.msk.bf16.gmra.mxu3 %vm717_vm3, %v1939_v48 }
 0x114   : > { %v453_v50 = vadd.f32 %v2088_v25, %v452_v49 }
 0x116   : > { %v500_v51 = vmax.f32 %v453_v50, 0.0 }
 0x118   : > { %v528_v52 = vpack.c.bf16 %v500_v51, %v500_v51 }
 0x11a   : > { %557 = vst.msk [vmem:[#allocation2 + $0x3c] sm:$0xf] %vm541_vm2, %v528_v52  ;;  %v2215_v52 = vld [vmem:[%s2389_s4] ss:$0 sm:$0xff] }
 0x11b   : > { %v455_v53 = vpop.f32.mrf.mxu0 }
 0x11c   : > { %v456_v54 = vadd.f32 %v2088_v25, %v455_v53 }
 0x11e   : > { %v501_v55 = vmax.f32 %v456_v54, 0.0 }
 0x120   : > { %v529_v56 = vpack.c.bf16 %v501_v55, %v501_v55 }
 0x121   : > { %v1917_v57 = vld [vmem:[#allocation2 + $0x38] sm:$0xff] }
 0x122   : > { %v1940_v58 = vld [vmem:[#allocation2 + $0x38] sm:$0xff]  ;;  %558 = vst.msk [vmem:[#allocation2 + $0x40] sm:$0xf] %vm541_vm2, %v529_v56  ;;  %1747 = vmatmul.msk.bf16.gmra.mxu1 %vm717_vm3, %v1917_v57  ;;  %1788 = vmatmul.msk.bf16.gmra.mxu2 %vm717_vm3, %v1917_v57 }
 0x123   : > { %v457_v59 = vpop.f32.mrf.mxu0  ;;  %1882 = vmatmul.msk.bf16.gmra.mxu3 %vm717_vm3, %v1940_v58 }
 0x124   : > { %v458_v60 = vadd.f32 %v2088_v25, %v457_v59 }
 0x126   : > { %v502_v61 = vmax.f32 %v458_v60, 0.0 }
 0x128   : > { %v530_v62 = vpack.c.bf16 %v502_v61, %v502_v61 }
 0x12a   : > { %559 = vst.msk [vmem:[#allocation2 + $0x44] sm:$0xf] %vm541_vm2, %v530_v62 }
 0x12b   : > { %v460_v63 = vpop.f32.mrf.mxu0 }
 0x12c   : > { %v461_v0 = vadd.f32 %v2088_v25, %v460_v63 }
 0x12e   : > { %v503_v1 = vmax.f32 %v461_v0, 0.0 }
 0x130   : > { %v531_v2 = vpack.c.bf16 %v503_v1, %v503_v1 }
 0x131   : > { %v1918_v3 = vld [vmem:[#allocation2 + $0x40] sm:$0xff] }
 0x132   : > { %v1941_v4 = vld [vmem:[#allocation2 + $0x40] sm:$0xff]  ;;  %560 = vst.msk [vmem:[#allocation2 + $0x48] sm:$0xf] %vm541_vm2, %v531_v2  ;;  %1748 = vmatmul.msk.bf16.gmra.mxu1 %vm717_vm3, %v1918_v3  ;;  %1789 = vmatmul.msk.bf16.gmra.mxu2 %vm717_vm3, %v1918_v3 }
 0x133   : > { %v462_v5 = vpop.f32.mrf.mxu0  ;;  %1883 = vmatmul.msk.bf16.gmra.mxu3 %vm717_vm3, %v1941_v4 }
 0x134   : > { %v463_v6 = vadd.f32 %v2088_v25, %v462_v5 }
 0x135   : > { %v876_v8 = vpop.f32.mrf.mxu2 }
 0x136   : > { %v504_v7 = vmax.f32 %v463_v6, 0.0 }
 0x138   : > { %v532_v9 = vpack.c.bf16 %v504_v7, %v504_v7 }
 0x13a   : > { %561 = vst.msk [vmem:[#allocation2 + $0x4c] sm:$0xf] %vm541_vm2, %v532_v9 }
 0x13b   : > { %v465_v10 = vpop.f32.mrf.mxu0 }
 0x13c   : > { %v466_v11 = vadd.f32 %v2088_v25, %v465_v10 }
 0x13d   : > { %v878_v13 = vpop.f32.mrf.mxu2 }
 0x13e   : > { %v505_v12 = vmax.f32 %v466_v11, 0.0 }
 0x13f   : > { %v763_v15 = vpop.f32.mrf.mxu1 }
 0x140   : > { %v533_v14 = vpack.c.bf16 %v505_v12, %v505_v12  ;;  %v877_v49 = vadd.f32 %v876_v8, %v763_v15 }
 0x141   : > { %v1919_v16 = vld [vmem:[#allocation2 + $0x48] sm:$0xff] }
 0x142   : > { %v1942_v17 = vld [vmem:[#allocation2 + $0x48] sm:$0xff]  ;;  %562 = vst.msk [vmem:[#allocation2 + $0x50] sm:$0xf] %vm541_vm2, %v533_v14  ;;  %1749 = vmatmul.msk.bf16.gmra.mxu1 %vm717_vm3, %v1919_v16  ;;  %1790 = vmatmul.msk.bf16.gmra.mxu2 %vm717_vm3, %v1919_v16 }
 0x143   : > { %v467_v18 = vpop.f32.mrf.mxu0  ;;  %1884 = vmatmul.msk.bf16.gmra.mxu3 %vm717_vm3, %v1942_v17 }
 0x144   : > { %v468_v19 = vadd.f32 %v2088_v25, %v467_v18 }
 0x145   : > { %v881_v21 = vpop.f32.mrf.mxu2 }
 0x146   : > { %v506_v20 = vmax.f32 %v468_v19, 0.0 }
 0x147   : > { %v765_v23 = vpop.f32.mrf.mxu1 }
 0x148   : > { %v534_v22 = vpack.c.bf16 %v506_v20, %v506_v20  ;;  %v879_v62 = vadd.f32 %v878_v13, %v765_v23 }
 0x14a   : > { %563 = vst.msk [vmem:[#allocation2 + $0x54] sm:$0xf] %vm541_vm2, %v534_v22 }
 0x14b   : > { %v470_v24 = vpop.f32.mrf.mxu0 }
 0x14c   : > { %v471_v26 = vadd.f32 %v2088_v25, %v470_v24 }
 0x14d   : > { %v883_v28 = vpop.f32.mrf.mxu2 }
 0x14e   : > { %v507_v27 = vmax.f32 %v471_v26, 0.0 }
 0x14f   : > { %v768_v30 = vpop.f32.mrf.mxu1 }
 0x150   : > { %v535_v29 = vpack.c.bf16 %v507_v27, %v507_v27  ;;  %v882_v54 = vadd.f32 %v881_v21, %v768_v30 }
 0x151   : > { %v1920_v31 = vld [vmem:[#allocation2 + $0x50] sm:$0xff] }
 0x152   : > { %v1943_v32 = vld [vmem:[#allocation2 + $0x50] sm:$0xff]  ;;  %564 = vst.msk [vmem:[#allocation2 + $0x58] sm:$0xf] %vm541_vm2, %v535_v29  ;;  %1750 = vmatmul.msk.bf16.gmra.mxu1 %vm717_vm3, %v1920_v31  ;;  %1791 = vmatmul.msk.bf16.gmra.mxu2 %vm717_vm3, %v1920_v31 }
 0x153   : > { %v472_v33 = vpop.f32.mrf.mxu0  ;;  %1885 = vmatmul.msk.bf16.gmra.mxu3 %vm717_vm3, %v1943_v32 }
 0x154   : > { %v473_v34 = vadd.f32 %v2088_v25, %v472_v33 }
 0x155   : > { %v2203_v36 = vpop.f32.mrf.mxu2 }
 0x156   : > { %v508_v35 = vmax.f32 %v473_v34, 0.0  ;;  %v1114_v37 = vpop.f32.mrf.mxu3 }
 0x157   : > { %v770_v39 = vpop.f32.mrf.mxu1  ;;  %v1174_v51 = vadd.f32 %v1114_v37, %v877_v49 }
 0x158   : > { %v536_v38 = vpack.c.bf16 %v508_v35, %v508_v35  ;;  %v884_v5 = vadd.f32 %v883_v28, %v770_v39 }
 0x159   : > { %v1202_v58 = vadd.f32 %v2215_v52, %v1174_v51 }
 0x15a   : > { %565 = vst.msk [vmem:[#allocation2 + $0x5c] sm:$0xf] %vm541_vm2, %v536_v38 }
 0x15b   : > { %v475_v40 = vpop.f32.mrf.mxu0  ;;  %v1226_v1 = vmax.f32 %v1202_v58, 0.0 }
 0x15c   : > { %v476_v41 = vadd.f32 %v2088_v25, %v475_v40 }
 0x15d   : > { %v2207_v43 = vpop.f32.mrf.mxu2 }
 0x15e   : > { %v509_v42 = vmax.f32 %v476_v41, 0.0  ;;  %v1116_v44 = vpop.f32.mrf.mxu3 }
 0x15f   : > { %v773_v46 = vpop.f32.mrf.mxu1  ;;  %v1175_v2 = vadd.f32 %v1116_v44, %v879_v62 }
 0x160   : > { %v537_v45 = vpack.c.bf16 %v509_v42, %v509_v42  ;;  %v887_v32 = vadd.f32 %v2203_v36, %v773_v46 }
 0x161   : > { %v1921_v47 = vld [vmem:[#allocation2 + $0x58] sm:$0xff]  ;;  %v1203_v10 = vadd.f32 %v2215_v52, %v1175_v2 }
 0x162   : > { %v1944_v48 = vld [vmem:[#allocation2 + $0x58] sm:$0xff]  ;;  %566 = vst.msk [vmem:[#allocation2 + $0x60] sm:$0xf] %vm541_vm2, %v537_v45  ;;  %1751 = vmatmul.msk.bf16.gmra.mxu1 %vm717_vm3, %v1921_v47  ;;  %1792 = vmatmul.msk.bf16.gmra.mxu2 %vm717_vm3, %v1921_v47 }
 0x163   : > { %v477_v50 = vpop.f32.mrf.mxu0  ;;  %1886 = vmatmul.msk.bf16.gmra.mxu3 %vm717_vm3, %v1944_v48  ;;  %v1227_v18 = vmax.f32 %v1203_v10, 0.0 }
 0x164   : > { %v478_v53 = vadd.f32 %v2088_v25, %v477_v50 }
 0x165   : > { %v891_v56 = vpop.f32.mrf.mxu2 }
 0x166   : > { %v510_v55 = vmax.f32 %v478_v53, 0.0  ;;  %v1119_v57 = vpop.f32.mrf.mxu3 }
 0x167   : > { %v1176_v60 = vadd.f32 %v1119_v57, %v882_v54  ;;  %v775_v61 = vpop.f32.mrf.mxu1 }
 0x168   : > { %v538_v59 = vpack.c.bf16 %v510_v55, %v510_v55  ;;  %v889_v39 = vadd.f32 %v2207_v43, %v775_v61 }
 0x169   : > { %v1204_v63 = vadd.f32 %v2215_v52, %v1176_v60 }
 0x16a   : > { %567 = vst.msk [vmem:[#allocation2 + $0x64] sm:$0xf] %vm541_vm2, %v538_v59 }
 0x16b   : > { %v480_v0 = vpop.f32.mrf.mxu0  ;;  %v1228_v3 = vmax.f32 %v1204_v63, 0.0 }
 0x16c   : > { %v481_v4 = vadd.f32 %v2088_v25, %v480_v0 }
 0x16d   : > { %v1250_v6 = vmax.f32 %v1226_v1, %v1228_v3  ;;  %v893_v8 = vpop.f32.mrf.mxu2 }
 0x16e   : > { %v511_v7 = vmax.f32 %v481_v4, 0.0  ;;  %v1121_v9 = vpop.f32.mrf.mxu3 }
 0x16f   : > { %1263 = vst.msk [vmem:[#allocation3] sm:$0xff] %vm1262_vm4, %v1250_v6  ;;  %v1177_v12 = vadd.f32 %v1121_v9, %v884_v5  ;;  %v778_v13 = vpop.f32.mrf.mxu1 }
 0x170   : > { %v539_v11 = vpack.c.bf16 %v511_v7, %v511_v7 }
 0x171   : > { %v1928_v14 = vld [vmem:[#allocation2 + $0x60] sm:$0xff]  ;;  %v1205_v16 = vadd.f32 %v2215_v52, %v1177_v12 }
 0x172   : > { %v1945_v15 = vld [vmem:[#allocation2 + $0x60] sm:$0xff]  ;;  %568 = vst.msk [vmem:[#allocation2 + $0x68] sm:$0xf] %vm541_vm2, %v539_v11  ;;  %1752 = vmatmul.msk.bf16.gmra.mxu1 %vm717_vm3, %v1928_v14 }
 0x173   : > { %v482_v17 = vpop.f32.mrf.mxu0  ;;  %v1229_v19 = vmax.f32 %v1205_v16, 0.0  ;;  %1887 = vmatmul.msk.bf16.gmra.mxu3 %vm717_vm3, %v1945_v15 }
 0x174   : > { %v483_v20 = vadd.f32 %v2088_v25, %v482_v17  ;;  %v892_v25 = vadd.f32 %v891_v56, %v778_v13 }
 0x175   : > { %v1251_v21 = vmax.f32 %v1227_v18, %v1229_v19  ;;  %v896_v23 = vpop.f32.mrf.mxu2 }
 0x176   : > { %v512_v22 = vmax.f32 %v483_v20, 0.0  ;;  %v1124_v24 = vpop.f32.mrf.mxu3 }
 0x177   : > { %1264 = vst.msk [vmem:[#allocation3 + $0x8] sm:$0xff] %vm1262_vm4, %v1251_v21  ;;  %v780_v27 = vpop.f32.mrf.mxu1  ;;  %v1178_v33 = vadd.f32 %v1124_v24, %v887_v32 }
 0x178   : > { %v540_v26 = vpack.c.bf16 %v512_v22, %v512_v22  ;;  %v894_v47 = vadd.f32 %v893_v8, %v780_v27 }
 0x179   : > { %v1206_v35 = vadd.f32 %v2215_v52, %v1178_v33 }
 0x17a   : > { %569 = vst.msk [vmem:[#allocation2 + $0x6c] sm:$0xf] %vm541_vm2, %v540_v26 }
 0x17b   : > { %v1230_v42 = vmax.f32 %v1206_v35, 0.0 }
 0x17d   : > { %v898_v30 = vpop.f32.mrf.mxu2 }
 0x17e   : > { %v1126_v28 = vpop.f32.mrf.mxu3 }
 0x17f   : > { %v783_v29 = vpop.f32.mrf.mxu1  ;;  %v1179_v44 = vadd.f32 %v1126_v28, %v889_v39 }
 0x180   : > { %v897_v61 = vadd.f32 %v896_v23, %v783_v29 }
 0x181   : > { %v1946_v31 = vld [vmem:[#allocation2 + $0x68] sm:$0xff]  ;;  %v1207_v46 = vadd.f32 %v2215_v52, %v1179_v44 }
 0x183   : > { %1888 = vmatmul.msk.bf16.gmra.mxu3 %vm717_vm3, %v1946_v31  ;;  %v1231_v53 = vmax.f32 %v1207_v46, 0.0 }
 0x185   : > { %v901_v41 = vpop.f32.mrf.mxu2 }
 0x186   : > { %v1129_v34 = vpop.f32.mrf.mxu3 }
 0x187   : > { %v1180_v37 = vadd.f32 %v1129_v34, %v892_v25  ;;  %v785_v38 = vpop.f32.mrf.mxu1 }
 0x188   : > { %v899_v5 = vadd.f32 %v898_v30, %v785_v38 }
 0x189   : > { %v1208_v40 = vadd.f32 %v2215_v52, %v1180_v37 }
 0x18b   : > { %v1232_v45 = vmax.f32 %v1208_v40, 0.0 }
 0x18d   : > { %v1252_v48 = vmax.f32 %v1230_v42, %v1232_v45  ;;  %v903_v43 = vpop.f32.mrf.mxu2 }
 0x18e   : > { %v1131_v36 = vpop.f32.mrf.mxu3 }
 0x18f   : > { %1265 = vst.msk [vmem:[#allocation3 + $0x10] sm:$0xff] %vm1262_vm4, %v1252_v48  ;;  %v1181_v49 = vadd.f32 %v1131_v36, %v894_v47  ;;  %v788_v50 = vpop.f32.mrf.mxu1 }
 0x190   : > { %v902_v63 = vadd.f32 %v901_v41, %v788_v50 }
 0x191   : > { %v1209_v51 = vadd.f32 %v2215_v52, %v1181_v49 }
 0x193   : > { %v1233_v54 = vmax.f32 %v1209_v51, 0.0 }
 0x195   : > { %v1253_v55 = vmax.f32 %v1231_v53, %v1233_v54  ;;  %v906_v58 = vpop.f32.mrf.mxu2 }
 0x196   : > { %v1134_v56 = vpop.f32.mrf.mxu3 }
 0x197   : > { %1266 = vst.msk [vmem:[#allocation3 + $0x18] sm:$0xff] %vm1262_vm4, %v1253_v55  ;;  %v790_v57 = vpop.f32.mrf.mxu1  ;;  %v1182_v62 = vadd.f32 %v1134_v56, %v897_v61 }
 0x198   : > { %v904_v10 = vadd.f32 %v903_v43, %v790_v57 }
 0x199   : > { %v1210_v1 = vadd.f32 %v2215_v52, %v1182_v62 }
 0x19b   : > { %v1234_v7 = vmax.f32 %v1210_v1, 0.0 }
 0x19d   : > { %v908_v4 = vpop.f32.mrf.mxu2 }
 0x19e   : > { %v1136_v59 = vpop.f32.mrf.mxu3 }
 0x19f   : > { %v793_v60 = vpop.f32.mrf.mxu1  ;;  %v1183_v8 = vadd.f32 %v1136_v59, %v899_v5 }
 0x1a0   : > { %v907_v26 = vadd.f32 %v906_v58, %v793_v60 }
 0x1a1   : > { %v1211_v13 = vadd.f32 %v2215_v52, %v1183_v8 }
 0x1a3   : > { %v1235_v18 = vmax.f32 %v1211_v13, 0.0 }
 0x1a5   : > { %v911_v17 = vpop.f32.mrf.mxu2 }
 0x1a6   : > { %v1139_v0 = vpop.f32.mrf.mxu3 }
 0x1a7   : > { %v1184_v2 = vadd.f32 %v1139_v0, %v902_v63  ;;  %v795_v3 = vpop.f32.mrf.mxu1 }
 0x1a8   : > { %v909_v25 = vadd.f32 %v908_v4, %v795_v3 }
 0x1a9   : > { %v1212_v6 = vadd.f32 %v2215_v52, %v1184_v2 }
 0x1ab   : > { %v1236_v9 = vmax.f32 %v1212_v6, 0.0 }
 0x1ad   : > { %v1254_v11 = vmax.f32 %v1234_v7, %v1236_v9  ;;  %v913_v23 = vpop.f32.mrf.mxu2 }
 0x1ae   : > { %v1141_v12 = vpop.f32.mrf.mxu3 }
 0x1af   : > { %1267 = vst.msk [vmem:[#allocation3 + $0x20] sm:$0xff] %vm1262_vm4, %v1254_v11  ;;  %v1185_v14 = vadd.f32 %v1141_v12, %v904_v10  ;;  %v798_v15 = vpop.f32.mrf.mxu1 }
 0x1b0   : > { %v912_v29 = vadd.f32 %v911_v17, %v798_v15  ;;  %v1396_v17 = vld [vmem:[#allocation3 + $0x16] sm:$0x1] }
 0x1b1   : > { %v1213_v16 = vadd.f32 %v2215_v52, %v1185_v14 }
 0x1b3   : > { %v1237_v19 = vmax.f32 %v1213_v16, 0.0 }
 0x1b5   : > { %v1255_v20 = vmax.f32 %v1235_v18, %v1237_v19  ;;  %v916_v30 = vpop.f32.mrf.mxu2  ;;  %v1402_v18 = vld [vmem:[#allocation3 + $0x17] sm:$0x1]  ;;  %v1318_v19 = vld [vmem:[#allocation3 + $0x12] sm:$0x1] }
 0x1b6   : > { %v1144_v21 = vpop.f32.mrf.mxu3 }
 0x1b7   : > { %1268 = vst.msk [vmem:[#allocation3 + $0x28] sm:$0xff] %vm1262_vm4, %v1255_v20  ;;  %v800_v22 = vpop.f32.mrf.mxu1  ;;  %v1186_v27 = vadd.f32 %v1144_v21, %v907_v26  ;;  %v1324_v20 = vld [vmem:[#allocation3 + $0x13] sm:$0x1]  ;;  %v1471_v26 = vld [vmem:[#allocation3 + $0x1a] sm:$0x1] }
 0x1b8   : > { %v914_v39 = vadd.f32 %v913_v23, %v800_v22  ;;  %v1357_v22 = vld [vmem:[#allocation3 + $0x14] sm:$0x1]  ;;  %v1363_v23 = vld [vmem:[#allocation3 + $0x15] sm:$0x1] }
 0x1b9   : > { %v1214_v32 = vadd.f32 %v2215_v52, %v1186_v27  ;;  %v1477_v27 = vld [vmem:[#allocation3 + $0x1b] sm:$0x1] }
 0x1bb   : > { %v1238_v35 = vmax.f32 %v1214_v32, 0.0 }
 0x1bd   : > { %v918_v47 = vpop.f32.mrf.mxu2 }
 0x1be   : > { %v1146_v24 = vpop.f32.mrf.mxu3 }
 0x1bf   : > { %v803_v28 = vpop.f32.mrf.mxu1  ;;  %v1187_v37 = vadd.f32 %v1146_v24, %v909_v25  ;;  %v1276_v24 = vld [vmem:[#allocation3 + $0x10] sm:$0x1]  ;;  %v1483_v25 = vmax.f32 %v1471_v26, %v1477_v27 }
 0x1c0   : > { %v917_v43 = vadd.f32 %v916_v30, %v803_v28  ;;  %v1282_v28 = vld [vmem:[#allocation3 + $0x11] sm:$0x1]  ;;  %v1408_v30 = vmax.f32 %v1396_v17, %v1402_v18  ;;  %v2283_v17 = vld [vmem:[#allocation3 + $0x5] sm:$0x1] }
 0x1c1   : > { %v1215_v44 = vadd.f32 %v2215_v52, %v1187_v37 }
 0x1c3   : > { %v1239_v36 = vmax.f32 %v1215_v44, 0.0  ;;  %v1441_v44 = vld [vmem:[#allocation3 + $0x19] sm:$0x1] }
 0x1c5   : > { %v921_v53 = vpop.f32.mrf.mxu2 }
 0x1c6   : > { %v1149_v31 = vpop.f32.mrf.mxu3 }
 0x1c7   : > { %v1188_v33 = vadd.f32 %v1149_v31, %v912_v29  ;;  %v805_v41 = vpop.f32.mrf.mxu1 }
 0x1c8   : > { %v919_v62 = vadd.f32 %v918_v47, %v805_v41  ;;  %v1397_v41 = vld [vmem:[#allocation3 + $0x26] sm:$0x1] }
 0x1c9   : > { %v1216_v34 = vadd.f32 %v2215_v52, %v1188_v33  ;;  %v1330_v33 = vmax.f32 %v1318_v19, %v1324_v20 }
 0x1cb   : > { %v1240_v38 = vmax.f32 %v1216_v34, 0.0  ;;  %v1369_v34 = vmax.f32 %v1357_v22, %v1363_v23  ;;  %v2261_v47 = vrot.slane %v1330_v33, 7 }
 0x1cd   : > { %v1256_v40 = vmax.f32 %v1238_v35, %v1240_v38  ;;  %v923_v57 = vpop.f32.mrf.mxu2  ;;  %v1288_v35 = vmax.f32 %v1276_v24, %v1282_v28  ;;  %v2259_v38 = vrot.slane %v1408_v30, 7 }
 0x1ce   : > { %v1151_v42 = vpop.f32.mrf.mxu3 }
 0x1cf   : > { %1269 = vst.msk [vmem:[#allocation3 + $0x30] sm:$0xff] %vm1262_vm4, %v1256_v40  ;;  %v1189_v45 = vadd.f32 %v1151_v42, %v914_v39  ;;  %v808_v51 = vpop.f32.mrf.mxu1  ;;  %v1435_v39 = vld [vmem:[#allocation3 + $0x18] sm:$0x1]  ;;  %v1403_v42 = vld [vmem:[#allocation3 + $0x27] sm:$0x1] }
 0x1d0   : > { %v922_v58 = vadd.f32 %v921_v53, %v808_v51  ;;  %v1319_v51 = vld [vmem:[#allocation3 + $0x22] sm:$0x1]  ;;  %v1325_v53 = vld [vmem:[#allocation3 + $0x23] sm:$0x1] }
 0x1d1   : > { %v1217_v48 = vadd.f32 %v2215_v52, %v1189_v45 }
 0x1d3   : > { %v1241_v46 = vmax.f32 %v1217_v48, 0.0  ;;  %v2263_v48 = vrot.slane %v1483_v25, 7 }
 0x1d5   : > { %v1257_v49 = vmax.f32 %v1239_v36, %v1241_v46  ;;  %v926_v6 = vpop.f32.mrf.mxu2  ;;  %v2265_v36 = vrot.slane %v1369_v34, 7  ;;  %v2267_v46 = vrot.slane %v1288_v35, 7  ;;  %v1275_v35 = vld [vmem:[#allocation3] sm:$0x1] }
 0x1d6   : > { %v1154_v50 = vpop.f32.mrf.mxu3  ;;  %v1278_v27 = vld [vmem:[#allocation3 + $0x30] sm:$0x1]  ;;  %v1284_v28 = vld [vmem:[#allocation3 + $0x31] sm:$0x1] }
 0x1d7   : > { %1270 = vst.msk [vmem:[#allocation3 + $0x38] sm:$0xff] %vm1262_vm4, %v1257_v49  ;;  %v810_v55 = vpop.f32.mrf.mxu1  ;;  %v1190_v56 = vadd.f32 %v1154_v50, %v917_v43  ;;  %v2270_v43 = vld [vmem:[#allocation3 + $0x6] sm:$0x1] }
 0x1d8   : > { %v924_v4 = vadd.f32 %v923_v57, %v810_v55  ;;  %v2272_v55 = vld [vmem:[#allocation3 + $0x7] sm:$0x1]  ;;  %v1364_v57 = vld [vmem:[#allocation3 + $0x25] sm:$0x1] }
 0x1d9   : > { %v1218_v60 = vadd.f32 %v2215_v52, %v1190_v56  ;;  %v1409_v56 = vmax.f32 %v1397_v41, %v1403_v42  ;;  %v1281_v42 = vld [vmem:[#allocation3 + $0x1] sm:$0x1] }
 0x1db   : > { %v1242_v0 = vmax.f32 %v1218_v60, 0.0  ;;  %v1447_v60 = vmax.f32 %v1435_v39, %v1441_v44 }
 0x1dd   : > { %v928_v16 = vpop.f32.mrf.mxu2  ;;  %v2285_v20 = vrot.slane %v1447_v60, 7 }
 0x1de   : > { %v1156_v54 = vpop.f32.mrf.mxu3 }
 0x1df   : > { %v1191_v1 = vadd.f32 %v1156_v54, %v919_v62  ;;  %v813_v3 = vpop.f32.mrf.mxu1  ;;  %v1358_v54 = vld [vmem:[#allocation3 + $0x24] sm:$0x1] }
 0x1e0   : > { %v927_v31 = vadd.f32 %v926_v6, %v813_v3  ;;  %v1436_v3 = vld [vmem:[#allocation3 + $0x28] sm:$0x1]  ;;  %v1404_v6 = vld [vmem:[#allocation3 + $0x37] sm:$0x1]  ;;  %v1370_v18 = vmax.f32 %v1358_v54, %v1364_v57  ;;  %v2300_v57 = vld [vmem:[#allocation3 + $0xb] sm:$0x1] }
 0x1e1   : > { %v1219_v8 = vadd.f32 %v2215_v52, %v1191_v1  ;;  %v1472_v1 = vld [vmem:[#allocation3 + $0x2a] sm:$0x1] }
 0x1e3   : > { %v1243_v11 = vmax.f32 %v1219_v8, 0.0 }
 0x1e5   : > { %v931_v32 = vpop.f32.mrf.mxu2 }
 0x1e6   : > { %v1159_v59 = vpop.f32.mrf.mxu3 }
 0x1e7   : > { %v1192_v61 = vadd.f32 %v1159_v59, %v922_v58  ;;  %v815_v14 = vpop.f32.mrf.mxu1  ;;  %v1277_v58 = vld [vmem:[#allocation3 + $0x20] sm:$0x1]  ;;  %v1283_v59 = vld [vmem:[#allocation3 + $0x21] sm:$0x1] }
 0x1e8   : > { %v1289_v19 = vmax.f32 %v1277_v58, %v1283_v59 }
 0x1e9   : > { %v1220_v63 = vadd.f32 %v2215_v52, %v1192_v61  ;;  %v929_v61 = vadd.f32 %v928_v16, %v815_v14  ;;  %v2281_v16 = vld [vmem:[#allocation3 + $0x4] sm:$0x1] }
 0x1ea   : > { %v1368_v44 = vmax.f32 %v2281_v16, %v2283_v17 }
 0x1eb   : > { %v1244_v2 = vmax.f32 %v1220_v63, 0.0  ;;  %v2275_v63 = vld [vmem:[#allocation3 + $0x2] sm:$0x1] }
 0x1ed   : > { %v1258_v5 = vmax.f32 %v1242_v0, %v1244_v2  ;;  %v2277_v0 = vld [vmem:[#allocation3 + $0x3] sm:$0x1]  ;;  %v1478_v2 = vld [vmem:[#allocation3 + $0x2b] sm:$0x1]  ;;  %v933_v14 = vpop.f32.mrf.mxu2 }
 0x1ee   : > { %v1161_v7 = vpop.f32.mrf.mxu3  ;;  %v1484_v26 = vmax.f32 %v1472_v1, %v1478_v2  ;;  %v1329_v25 = vmax.f32 %v2275_v63, %v2277_v0  ;;  %v2311_v1 = vld [vmem:[#allocation3 + $0x3a] sm:$0x1]  ;;  %v2313_v2 = vld [vmem:[#allocation3 + $0x3b] sm:$0x1] }
 0x1ef   : > { %1271 = vst.msk [vmem:[#allocation3 + $0x40] sm:$0xff] %vm1262_vm4, %v1258_v5  ;;  %v1193_v9 = vadd.f32 %v1161_v7, %v924_v4  ;;  %v818_v29 = vpop.f32.mrf.mxu1  ;;  %v1398_v5 = vld [vmem:[#allocation3 + $0x36] sm:$0x1]  ;;  %v1442_v7 = vld [vmem:[#allocation3 + $0x29] sm:$0x1] }
 0x1f0   : > { %v932_v40 = vadd.f32 %v931_v32, %v818_v29  ;;  %v2302_v58 = vrot.slane %v1484_v26, 6 }
 0x1f1   : > { %v1221_v10 = vadd.f32 %v2215_v52, %v1193_v9 }
 0x1f3   : > { %v1245_v12 = vmax.f32 %v1221_v10, 0.0 }
 0x1f5   : > { %v1259_v13 = vmax.f32 %v1243_v11, %v1245_v12  ;;  %v1320_v11 = vld [vmem:[#allocation3 + $0x32] sm:$0x1]  ;;  %v1326_v12 = vld [vmem:[#allocation3 + $0x33] sm:$0x1] }
 0x1f6   : > { %v1164_v15 = vpop.f32.mrf.mxu3  ;;  %v1399_v24 = vld [vmem:[#allocation3 + $0x46] sm:$0x1]  ;;  %v1405_v30 = vld [vmem:[#allocation3 + $0x47] sm:$0x1]  ;;  %v1321_v32 = vld [vmem:[#allocation3 + $0x42] sm:$0x1]  ;;  %v1332_v34 = vmax.f32 %v1320_v11, %v1326_v12 }
 0x1f7   : > { %1272 = vst.msk [vmem:[#allocation3 + $0x48] sm:$0xff] %vm1262_vm4, %v1259_v13  ;;  %v1194_v37 = vadd.f32 %v1164_v15, %v927_v31  ;;  %v820_v4 = vpop.f32.mrf.mxu1  ;;  %v1331_v13 = vmax.f32 %v1319_v51, %v1325_v53  ;;  %v2279_v15 = vrot.slane %v1409_v56, 6  ;;  %v1410_v31 = vmax.f32 %v1398_v5, %v1404_v6  ;;  %v1327_v33 = vld [vmem:[#allocation3 + $0x43] sm:$0x1]  ;;  %v2298_v56 = vld [vmem:[#allocation3 + $0xa] sm:$0x1] }
 0x1f8   : > { %v934_v22 = vadd.f32 %v933_v14, %v820_v4  ;;  %v1290_v51 = vmax.f32 %v1278_v27, %v1284_v28  ;;  %v1302_v53 = vrot.slane %v1289_v19, 6  ;;  %v1345_v60 = vrot.slane %v1332_v34, 5  ;;  %v1366_v19 = vld [vmem:[#allocation3 + $0x45] sm:$0x1] }
 0x1f9   : > { %v1222_v49 = vadd.f32 %v2215_v52, %v1194_v37  ;;  %v1448_v37 = vmax.f32 %v1436_v3, %v1442_v7  ;;  %v1343_v41 = vrot.slane %v1331_v13, 6  ;;  %v1423_v59 = vrot.slane %v1410_v31, 5 }
 0x1fa   : > { %v1287_v4 = vmax.f32 %v1275_v35, %v1281_v42  ;;  %v1342_v6 = vsel %vm1300_vm5, %v2261_v47, %v1329_v25  ;;  %v1305_v7 = vrot.slane %v1290_v51, 5  ;;  %v1482_v26 = vmax.f32 %v2298_v56, %v2300_v57 }
 0x1fb   : > { %v1246_v8 = vmax.f32 %v1222_v49, 0.0  ;;  %v1279_v49 = vld [vmem:[#allocation3 + $0x40] sm:$0x1]  ;;  %v2309_v63 = vrot.slane %v1448_v37, 6  ;;  %v1344_v47 = vsel %vm1303_vm6, %v1343_v41, %v1342_v6  ;;  %v1485_v25 = vmax.f32 %v2311_v1, %v2313_v2 }
 0x1fd   : > { %v1498_v2 = vrot.slane %v1485_v25, 5 }
 0x1fe   : > { %v1166_v21 = vpop.f32.mrf.mxu3  ;;  %v1474_v13 = vld [vmem:[#allocation3 + $0x4a] sm:$0x1]  ;;  %v1480_v14 = vld [vmem:[#allocation3 + $0x4b] sm:$0x1] }
 0x1ff   : > { %v1195_v9 = vadd.f32 %v1166_v21, %v929_v61  ;;  %v1407_v21 = vmax.f32 %v2270_v43, %v2272_v55  ;;  %v1411_v43 = vmax.f32 %v1399_v24, %v1405_v30  ;;  %v1333_v55 = vmax.f32 %v1321_v32, %v1327_v33  ;;  %v2305_v61 = vld [vmem:[#allocation3 + $0x34] sm:$0x1]  ;;  %v1438_v32 = vld [vmem:[#allocation3 + $0x48] sm:$0x1] }
 0x200   : > { %v1346_v33 = vsel %vm1306_vm7, %v1345_v60, %v1344_v47  ;;  %v1486_v41 = vmax.f32 %v1474_v13, %v1480_v14  ;;  %v1440_v60 = vld [vmem:[#allocation3 + $0x9] sm:$0x1] }
 0x201   : > { %v1223_v39 = vadd.f32 %v2215_v52, %v1195_v9  ;;  %v1420_v5 = vsel %vm1300_vm5, %v2259_v38, %v1407_v21  ;;  %v1443_v9 = vld [vmem:[#allocation3 + $0x39] sm:$0x1]  ;;  %v1425_v11 = vrot.slane %v1411_v43, 4  ;;  %v1347_v12 = vrot.slane %v1333_v55, 4 }
 0x202   : > { %v1422_v38 = vsel %vm1303_vm6, %v2279_v15, %v1420_v5 }
 0x203   : > { %v1247_v0 = vmax.f32 %v1223_v39, 0.0  ;;  %v1444_v39 = vld [vmem:[#allocation3 + $0x49] sm:$0x1] }
 0x206   : > { %v1169_v45 = vpop.f32.mrf.mxu3 }
 0x207   : > { %v1196_v50 = vadd.f32 %v1169_v45, %v932_v40  ;;  %v2295_v45 = vrot.slane %v1370_v18, 6  ;;  %v1360_v18 = vld [vmem:[#allocation3 + $0x44] sm:$0x1] }
 0x208   : > { %v1372_v55 = vmax.f32 %v1360_v18, %v1366_v19 }
 0x209   : > { %v1224_v62 = vadd.f32 %v2215_v52, %v1196_v50  ;;  %v1285_v50 = vld [vmem:[#allocation3 + $0x41] sm:$0x1] }
 0x20a   : > { %v1291_v3 = vmax.f32 %v1279_v49, %v1285_v50 }
 0x20b   : > { %v1248_v10 = vmax.f32 %v1224_v62, 0.0  ;;  %v2307_v62 = vld [vmem:[#allocation3 + $0x35] sm:$0x1] }
 0x20c   : > { %v1308_v31 = vrot.slane %v1291_v3, 4  ;;  %v1500_v3 = vrot.slane %v1486_v41, 4 }
 0x20d   : > { %v1260_v23 = vmax.f32 %v1246_v8, %v1248_v10  ;;  %v1437_v8 = vld [vmem:[#allocation3 + $0x38] sm:$0x1] }
 0x20e   : > { %v1171_v29 = vpop.f32.mrf.mxu3  ;;  %v1449_v51 = vmax.f32 %v1437_v8, %v1443_v9  ;;  %v1381_v8 = vsel %vm1300_vm5, %v2265_v36, %v1368_v44 }
 0x20f   : > { %1273 = vst.msk [vmem:[#allocation3 + $0x50] sm:$0xff] %vm1262_vm4, %v1260_v23  ;;  %v1197_v40 = vadd.f32 %v1171_v29, %v934_v22  ;;  %v1301_v22 = vsel %vm1300_vm5, %v2267_v46, %v1287_v4  ;;  %v1424_v29 = vsel %vm1306_vm7, %v1423_v59, %v1422_v38  ;;  %v1371_v46 = vmax.f32 %v2305_v61, %v2307_v62  ;;  %v1434_v59 = vld [vmem:[#allocation3 + $0x8] sm:$0x1] }
 0x210   : > { %v1304_v27 = vsel %vm1303_vm6, %v1302_v53, %v1301_v22  ;;  %v1426_v53 = vsel %vm1309_vm8, %v1425_v11, %v1424_v29  ;;  %v1450_v61 = vmax.f32 %v1438_v32, %v1444_v39  ;;  %v1462_v5 = vrot.slane %v1449_v51, 5 }
 0x211   : > { %v1225_v54 = vadd.f32 %v2215_v52, %v1197_v40  ;;  %v1307_v37 = vsel %vm1306_vm7, %v1305_v7, %v1304_v27  ;;  %v1446_v9 = vmax.f32 %v1434_v59, %v1440_v60  ;;  %v1495_v11 = vsel %vm1300_vm5, %v2263_v48, %v1482_v26 }
 0x212   : > { %v1310_v1 = vsel %vm1309_vm8, %v1308_v31, %v1307_v37  ;;  %v1464_v18 = vrot.slane %v1450_v61, 4  ;;  %v1497_v19 = vsel %vm1303_vm6, %v2302_v58, %v1495_v11  ;;  %v1383_v44 = vsel %vm1303_vm6, %v2295_v45, %v1381_v8 }
 0x213   : > { %v1249_v52 = vmax.f32 %v1225_v54, 0.0  ;;  %v1348_v54 = vsel %vm1309_vm8, %v1347_v12, %v1346_v33  ;;  %v1386_v12 = vrot.slane %v1372_v55, 4  ;;  %v1459_v16 = vsel %vm1300_vm5, %v2285_v20, %v1446_v9 }
 0x214   : > { %v1499_v36 = vsel %vm1306_vm7, %v1498_v2, %v1497_v19  ;;  %v1461_v48 = vsel %vm1303_vm6, %v2309_v63, %v1459_v16 }
 0x215   : > { %v1261_v10 = vmax.f32 %v1247_v0, %v1249_v52  ;;  %v1384_v52 = vrot.slane %v1371_v46, 5  ;;  %v1463_v38 = vsel %vm1306_vm7, %v1462_v5, %v1461_v48 }
 0x216   : > { %v1400_v23 = vld [vmem:[#allocation3 + $0x56] sm:$0x1]  ;;  %v1406_v24 = vld [vmem:[#allocation3 + $0x57] sm:$0x1]  ;;  %v1322_v21 = vld [vmem:[#allocation3 + $0x52] sm:$0x1]  ;;  %v1465_v26 = vsel %vm1309_vm8, %v1464_v18, %v1463_v38 }
 0x217   : > { %1274 = vst.msk [vmem:[#allocation3 + $0x58] sm:$0xff] %vm1262_vm4, %v1261_v10  ;;  %v1412_v28 = vmax.f32 %v1400_v23, %v1406_v24  ;;  %v1328_v30 = vld [vmem:[#allocation3 + $0x53] sm:$0x1]  ;;  %v1280_v34 = vld [vmem:[#allocation3 + $0x50] sm:$0x1]  ;;  %v1501_v24 = vsel %vm1309_vm8, %v1500_v3, %v1499_v36  ;;  %v1385_v58 = vsel %vm1306_vm7, %v1384_v52, %v1383_v44 }
 0x218   : > { %v1334_v15 = vmax.f32 %v1322_v21, %v1328_v30  ;;  %v1286_v35 = vld [vmem:[#allocation3 + $0x51] sm:$0x1]  ;;  %v1361_v42 = vld [vmem:[#allocation3 + $0x54] sm:$0x1]  ;;  %v1367_v49 = vld [vmem:[#allocation3 + $0x55] sm:$0x1]  ;;  %v1387_v47 = vsel %vm1309_vm8, %v1386_v12, %v1385_v58 }
 0x219   : > { %v1427_v40 = vrot.slane %v1412_v28, 3  ;;  %v1292_v50 = vmax.f32 %v1280_v34, %v1286_v35  ;;  %v1373_v0 = vmax.f32 %v1361_v42, %v1367_v49 }
 0x21a   : > { %v1349_v43 = vrot.slane %v1334_v15, 3 }
 0x21b   : > { %v1428_v56 = vsel %vm1312_vm9, %v1427_v40, %v1426_v53  ;;  %v1311_v57 = vrot.slane %v1292_v50, 3  ;;  %v1388_v22 = vrot.slane %v1373_v0, 3 }
 0x21c   : > { %1429 = vrot.lane.b32.xlu1 %v1428_v56, %s1975_s7  ;;  %v1350_v62 = vsel %vm1312_vm9, %v1349_v43, %v1348_v54 }
 0x21d   : > { %1351 = vrot.lane.b32.xlu0 %v1350_v62, %s1976_s19  ;;  %v1313_v4 = vsel %vm1312_vm9, %v1311_v57, %v1310_v1  ;;  %v1389_v45 = vsel %vm1312_vm9, %v1388_v22, %v1387_v47 }
 0x21e   : > { %v1475_v6 = vld [vmem:[#allocation3 + $0x5a] sm:$0x1]  ;;  %v1481_v7 = vld [vmem:[#allocation3 + $0x5b] sm:$0x1]  ;;  %1316 = vst.msk [vmem:[%s2343_s6] sm:$0x3f] %vm1315_vm10, %v1313_v4 }
 0x21f   : > { %v1487_v10 = vmax.f32 %v1475_v6, %v1481_v7  ;;  %v1439_v13 = vld [vmem:[#allocation3 + $0x58] sm:$0x1]  ;;  %v1445_v14 = vld [vmem:[#allocation3 + $0x59] sm:$0x1] }
 0x220   : > { %v1451_v23 = vmax.f32 %v1439_v13, %v1445_v14 }
 0x221   : > { %v1502_v17 = vrot.slane %v1487_v10, 3 }
 0x222   : > { %v1466_v21 = vrot.slane %v1451_v23, 3 }
 0x223   : > { %v1503_v20 = vsel %vm1312_vm9, %v1502_v17, %v1501_v24 }
 0x224   : > { %1504 = vrot.lane.b32.xlu1 %v1503_v20, %s1976_s19  ;;  %v1467_v63 = vsel %vm1312_vm9, %v1466_v21, %v1465_v26 }
 0x225   : > { %1390 = vrot.lane.b32.xlu0 %v1389_v45, %s1977_s9  ;;  %1469 = vst.msk [vmem:[%s2343_s6 + $0x8] sm:$0x3f] %vm1315_vm10, %v1467_v63 }
 0x28e   : > { %v1430_v27 = vpop.permute.xlu1 %1429 }
 0x28f   : > { %v1352_v28 = vpop.permute.xlu0 %1351 }
 0x290   : > { %1355 = vst.msk [vmem:[%s2343_s6] sm:$0x3f] %vm1354_vm11, %v1352_v28 }
 0x296   : > { %v1505_v29 = vpop.permute.xlu1 %1504 }
 0x297   : > { %1507 = vst.msk [vmem:[%s2343_s6 + $0x8] sm:$0x3f] %vm1354_vm11, %v1505_v29  ;;  %v1391_v30 = vpop.permute.xlu0 %1390 }
 0x298   : > { %1394 = vst.msk [vmem:[%s2343_s6] sm:$0x3f] %vm1393_vm12, %v1391_v30 }
 0x299   : > { %1433 = vst.msk [vmem:[%s2343_s6] sm:$0x3f] %vm1432_vm13, %v1430_v27 }
 0x29a PF: > { %s15_s18 = sadd.s32 1, %s1973_s18  }
 0x29b   : > { %p12_p4 = scmp.ge.s32.totalorder %s15_s18, 4  }
 0x29d   :  { %14 = sbr.rel (!%p12_p4) target bundleno = 1 (0x1), region = 72 }

</bundles_post_ra>
